<compile_context>
chip_gen: v7x
topology: tpu7x:2x2x1
jax: 0.10.0
libtpu: 0.0.40
codegen_flags: <defaults>
</compile_context>

<pallas_src>
import jax
import jax.numpy as jnp
from jax.experimental import pallas as pl
from jax.experimental.pallas import tpu as pltpu

NUM_CLASSES = 20
IN_FEATURES = 7500          # 3 * 50 * 50
H1 = 128
H2 = 64

K_PAD = 7680                # 30 * 256, lane/sublane aligned, >= IN_FEATURES
N_PAD = 128                 # lane-dense padded class dim


def _round_up(v, m):
    return ((v + m - 1) // m) * m


def mlp_kernel(x_ref, w1_ref, b1_ref, w2_ref, b2_ref, w3_ref, b3_ref, o_ref):
    # x: (TM, K_PAD) bf16   w1: (K_PAD, 128) bf16   w2: (128, 64) f32
    # w3: (64, 128) f32 (zero-padded cols)          out: (TM, 128) f32
    h1 = jnp.dot(x_ref[...], w1_ref[...],
                 preferred_element_type=jnp.float32) + b1_ref[...]
    h1 = jnp.maximum(h1, 0.0)                       # ReLU; dropout1 = identity
    h2 = jnp.dot(h1, w2_ref[...],
                 preferred_element_type=jnp.float32) + b2_ref[...]
    h2 = jnp.maximum(h2, 0.0)                       # ReLU; dropout2 = identity
    logits = jnp.dot(h2, w3_ref[...],
                     preferred_element_type=jnp.float32) + b3_ref[...]
    o_ref[...] = logits


def prepare_params(params):
    """One-time preprocessing: pad K / N, narrow W1 to bf16."""
    w1, b1, w2, b2, w3, b3 = params
    w1p = jnp.zeros((K_PAD, H1), jnp.float32).at[:IN_FEATURES].set(w1)
    w1p = w1p.astype(jnp.bfloat16)                       # streamed dtype
    w3p = jnp.zeros((H2, N_PAD), jnp.float32).at[:, :NUM_CLASSES].set(w3)
    b3p = jnp.zeros((1, N_PAD), jnp.float32).at[:, :NUM_CLASSES].set(b3)
    return (w1p, b1, w2, b2, w3p, b3p)


def gesture_recognition_forward(x_nchw, prepared_params):
    w1p, b1, w2, b2, w3p, b3p = prepared_params
    B = x_nchw.shape[0]

    # torch.flatten(x, start_dim=1) on contiguous NCHW == reshape(B, -1)
    x = x_nchw.reshape(B, -1).astype(jnp.float32)
    assert x.shape[1] == IN_FEATURES

    # Batch tiling: TM rows per grid step (capped at 128), batch zero-padded.
    TM = min(128, _round_up(B, 8))
    B_pad = _round_up(B, TM)

    # Zero-pad K (exact) and batch, stream activations as bf16.
    x_pad = jnp.zeros((B_pad, K_PAD), jnp.float32)
    x_pad = x_pad.at[:B, :IN_FEATURES].set(x).astype(jnp.bfloat16)

    const = lambda shp: pl.BlockSpec(shp, lambda i: (0, 0))

    out = pl.pallas_call(
        mlp_kernel,
        out_shape=jax.ShapeDtypeStruct((B_pad, N_PAD), jnp.float32),
        grid_spec=pl.GridSpec(
            grid=(B_pad // TM,),
            in_specs=[
                pl.BlockSpec((TM, K_PAD), lambda i: (i, 0)),   # x: tiled over batch
                const((K_PAD, H1)),                            # weights: resident
                const((1, H1)),
                const((H1, H2)),
                const((1, H2)),
                const((H2, N_PAD)),
                const((1, N_PAD)),
            ],
            out_specs=pl.BlockSpec((TM, N_PAD), lambda i: (i, 0)),
        ),
        compiler_params=pltpu.CompilerParams(
            dimension_semantics=("parallel",),   # batch tiles independent (v7x 2 TCs)
            vmem_limit_bytes=16 << 20,
        ),
    )(x_pad, w1p, b1, w2, b2, w3p, b3p)

    return out[:B, :NUM_CLASSES]


def init_params(key):
    # Mimics PyTorch Linear init: U(-1/sqrt(fan_in), 1/sqrt(fan_in)).
    # Weights stored as (in_features, out_features) so the kernel does x @ W + b.
    k = jax.random.split(key, 6)

    def linear(kw, kb, fan_in, fan_out):
        bound = 1.0 / jnp.sqrt(jnp.float32(fan_in))
        w = jax.random.uniform(kw, (fan_in, fan_out), jnp.float32, -bound, bound)
        b = jax.random.uniform(kb, (1, fan_out), jnp.float32, -bound, bound)
        return w, b

    w1, b1 = linear(k[0], k[1], IN_FEATURES, H1)
    w2, b2 = linear(k[2], k[3], H1, H2)
    w3, b3 = linear(k[4], k[5], H2, NUM_CLASSES)
    return (w1, b1, w2, b2, w3, b3)


def reference_forward_bf16(x_nchw, params):
    """Reference matching the kernel's dtype strategy (bf16 layer-1 inputs, f32 accum)."""
    w1, b1, w2, b2, w3, b3 = params
    x = x_nchw.reshape(x_nchw.shape[0], -1).astype(jnp.float32)
    h1 = jax.nn.relu(
        jnp.dot(x.astype(jnp.bfloat16), w1.astype(jnp.bfloat16),
                preferred_element_type=jnp.float32) + b1)
    h2 = jax.nn.relu(h1 @ w2 + b2)
    return h2 @ w3 + b3


def reference_forward_f32(x_nchw, params):
    """Pure-f32 reference of the original PyTorch forward (semantics check)."""
    w1, b1, w2, b2, w3, b3 = params
    x = x_nchw.reshape(x_nchw.shape[0], -1).astype(jnp.float32)
    h1 = jax.nn.relu(x @ w1 + b1)
    h2 = jax.nn.relu(h1 @ w2 + b2)
    return h2 @ w3 + b3


if __name__ == "__main__":
    key = jax.random.PRNGKey(0)
    k_x, k_p = jax.random.split(key)

    B = 2
    x = jax.random.normal(k_x, (B, 3, 50, 50), jnp.float32)  # NCHW, 3*50*50 = 7500
    params = init_params(k_p)
    prepared = prepare_params(params)

    out = gesture_recognition_forward(x, prepared)
    out = jax.block_until_ready(out)

    assert out.shape == (B, NUM_CLASSES), out.shape

    # Tight check vs. reference using the same bf16 layer-1 streaming.
    ref_bf16 = reference_forward_bf16(x, params)
    assert jnp.allclose(out, ref_bf16, atol=5e-3, rtol=5e-3), "mismatch vs bf16 reference"

    # Looser check vs. the original pure-f32 forward (semantic equivalence).
    ref_f32 = reference_forward_f32(x, params)
    assert jnp.allclose(out, ref_f32, atol=5e-2, rtol=5e-2), "mismatch vs f32 reference"

    print("KERNEL_OK")
</pallas_src>

<mosaic_0001>
module attributes {stable_mosaic.version = 11 : i64} {
  func.func @mlp_kernel(%arg0: i32, %arg1: memref<8x7680xbf16, #tpu.memory_space<vmem>>, %arg2: memref<7680x128xbf16, #tpu.memory_space<vmem>>, %arg3: memref<1x128xf32, #tpu.memory_space<vmem>>, %arg4: memref<128x64xf32, #tpu.memory_space<vmem>>, %arg5: memref<1x64xf32, #tpu.memory_space<vmem>>, %arg6: memref<64x128xf32, #tpu.memory_space<vmem>>, %arg7: memref<1x128xf32, #tpu.memory_space<vmem>>, %arg8: memref<8x128xf32, #tpu.memory_space<vmem>>) attributes {dimension_semantics = [#tpu.dimension_semantics<parallel>], iteration_bounds = array<i64: 1>, scalar_prefetch = 0 : i64, scratch_operands = 0 : i64, tpu.core_type = #tpu.core_type<tc>, window_params = [{transform_indices = @transform_0, window_bounds = array<i64: 8, 7680>}, {pipeline_mode = #tpu.pipeline_mode<synchronous>, transform_indices = @transform_1, window_bounds = array<i64: 7680, 128>}, {pipeline_mode = #tpu.pipeline_mode<synchronous>, transform_indices = @transform_2, window_bounds = array<i64: 1, 128>}, {pipeline_mode = #tpu.pipeline_mode<synchronous>, transform_indices = @transform_3, window_bounds = array<i64: 128, 64>}, {pipeline_mode = #tpu.pipeline_mode<synchronous>, transform_indices = @transform_4, window_bounds = array<i64: 1, 64>}, {pipeline_mode = #tpu.pipeline_mode<synchronous>, transform_indices = @transform_5, window_bounds = array<i64: 64, 128>}, {pipeline_mode = #tpu.pipeline_mode<synchronous>, transform_indices = @transform_6, window_bounds = array<i64: 1, 128>}, {transform_indices = @transform_7, window_bounds = array<i64: 8, 128>}]} {
    %c0 = arith.constant 0 : index
    %c0_0 = arith.constant 0 : index
    %0 = vector.load %arg1[%c0, %c0_0] : memref<8x7680xbf16, #tpu.memory_space<vmem>>, vector<8x7680xbf16>
    %c0_1 = arith.constant 0 : index
    %c0_2 = arith.constant 0 : index
    %1 = vector.load %arg2[%c0_1, %c0_2] : memref<7680x128xbf16, #tpu.memory_space<vmem>>, vector<7680x128xbf16>
    %cst = arith.constant dense<0.000000e+00> : vector<8x128xf32>
    %2 = tpu.matmul %0, %1, %cst {dimension_numbers = #tpu.dot_dimension_numbers<[1], [0], [0], [1], [0, 0, 1, 1], [], []>} : vector<8x7680xbf16>, vector<7680x128xbf16>, vector<8x128xf32> -> vector<8x128xf32>
    %c0_3 = arith.constant 0 : index
    %c0_4 = arith.constant 0 : index
    %3 = vector.load %arg3[%c0_3, %c0_4] : memref<1x128xf32, #tpu.memory_space<vmem>>, vector<1x128xf32>
    %4 = vector.broadcast %3 : vector<1x128xf32> to vector<8x128xf32>
    %5 = arith.addf %2, %4 : vector<8x128xf32>
    %cst_5 = arith.constant 0.000000e+00 : f32
    %6 = vector.broadcast %cst_5 : f32 to vector<8x128xf32>
    %7 = arith.maximumf %5, %6 : vector<8x128xf32>
    %c0_6 = arith.constant 0 : index
    %c0_7 = arith.constant 0 : index
    %8 = vector.load %arg4[%c0_6, %c0_7] : memref<128x64xf32, #tpu.memory_space<vmem>>, vector<128x64xf32>
    %cst_8 = arith.constant dense<0.000000e+00> : vector<8x64xf32>
    %9 = tpu.matmul %7, %8, %cst_8 {dimension_numbers = #tpu.dot_dimension_numbers<[1], [0], [0], [1], [0, 0, 1, 1], [], []>} : vector<8x128xf32>, vector<128x64xf32>, vector<8x64xf32> -> vector<8x64xf32>
    %c0_9 = arith.constant 0 : index
    %c0_10 = arith.constant 0 : index
    %10 = vector.load %arg5[%c0_9, %c0_10] : memref<1x64xf32, #tpu.memory_space<vmem>>, vector<1x64xf32>
    %11 = vector.broadcast %10 : vector<1x64xf32> to vector<8x64xf32>
    %12 = arith.addf %9, %11 : vector<8x64xf32>
    %cst_11 = arith.constant 0.000000e+00 : f32
    %13 = vector.broadcast %cst_11 : f32 to vector<8x64xf32>
    %14 = arith.maximumf %12, %13 : vector<8x64xf32>
    %c0_12 = arith.constant 0 : index
    %c0_13 = arith.constant 0 : index
    %15 = vector.load %arg6[%c0_12, %c0_13] : memref<64x128xf32, #tpu.memory_space<vmem>>, vector<64x128xf32>
    %cst_14 = arith.constant dense<0.000000e+00> : vector<8x128xf32>
    %16 = tpu.matmul %14, %15, %cst_14 {dimension_numbers = #tpu.dot_dimension_numbers<[1], [0], [0], [1], [0, 0, 1, 1], [], []>} : vector<8x64xf32>, vector<64x128xf32>, vector<8x128xf32> -> vector<8x128xf32>
    %c0_15 = arith.constant 0 : index
    %c0_16 = arith.constant 0 : index
    %17 = vector.load %arg7[%c0_15, %c0_16] : memref<1x128xf32, #tpu.memory_space<vmem>>, vector<1x128xf32>
    %18 = vector.broadcast %17 : vector<1x128xf32> to vector<8x128xf32>
    %19 = arith.addf %16, %18 : vector<8x128xf32>
    %c0_17 = arith.constant 0 : index
    %c0_18 = arith.constant 0 : index
    %20 = vector.load %arg8[%c0_17, %c0_18] : memref<8x128xf32, #tpu.memory_space<vmem>>, vector<8x128xf32>
    tpu.vector_store %arg8[%c0_17, %c0_18], %19 {strides = array<i32>} : memref<8x128xf32, #tpu.memory_space<vmem>>, vector<8x128xf32>,
    return
  }
  func.func @transform_0(%arg0: i32) -> (i32, i32) {
    %c0_i32 = arith.constant 0 : i32
    %c0_i32_0 = arith.constant 0 : i32
    return %arg0, %c0_i32 : i32, i32
  }
  func.func @transform_1(%arg0: i32) -> (i32, i32) {
    %c0_i32 = arith.constant 0 : i32
    %c0_i32_0 = arith.constant 0 : i32
    %c0_i32_1 = arith.constant 0 : i32
    return %c0_i32, %c0_i32_0 : i32, i32
  }
  func.func @transform_2(%arg0: i32) -> (i32, i32) {
    %c0_i32 = arith.constant 0 : i32
    %c0_i32_0 = arith.constant 0 : i32
    %c0_i32_1 = arith.constant 0 : i32
    return %c0_i32, %c0_i32_0 : i32, i32
  }
  func.func @transform_3(%arg0: i32) -> (i32, i32) {
    %c0_i32 = arith.constant 0 : i32
    %c0_i32_0 = arith.constant 0 : i32
    %c0_i32_1 = arith.constant 0 : i32
    return %c0_i32, %c0_i32_0 : i32, i32
  }
  func.func @transform_4(%arg0: i32) -> (i32, i32) {
    %c0_i32 = arith.constant 0 : i32
    %c0_i32_0 = arith.constant 0 : i32
    %c0_i32_1 = arith.constant 0 : i32
    return %c0_i32, %c0_i32_0 : i32, i32
  }
  func.func @transform_5(%arg0: i32) -> (i32, i32) {
    %c0_i32 = arith.constant 0 : i32
    %c0_i32_0 = arith.constant 0 : i32
    %c0_i32_1 = arith.constant 0 : i32
    return %c0_i32, %c0_i32_0 : i32, i32
  }
  func.func @transform_6(%arg0: i32) -> (i32, i32) {
    %c0_i32 = arith.constant 0 : i32
    %c0_i32_0 = arith.constant 0 : i32
    %c0_i32_1 = arith.constant 0 : i32
    return %c0_i32, %c0_i32_0 : i32, i32
  }
  func.func @transform_7(%arg0: i32) -> (i32, i32) {
    %c0_i32 = arith.constant 0 : i32
    %c0_i32_0 = arith.constant 0 : i32
    return %arg0, %c0_i32 : i32, i32
  }
}

</mosaic_0001>

<bundles_post_ra>
// kernel: tpu_custom_call.1
= control target key start
LH: loop header
LB: loop body
LE: loop exit
PB: predicated region body
PF: predicated region fallthrough
CT: control target
= control target key end

     0   :  { %12 = vsyncpa [#allocation3], 0  ;;  %s7849_s0 = inlined_call_operand.hbm [shape: bf16[8,7680], index: 0, kind: input, shape index: {}]   ;;  %s7850_s1 = inlined_call_operand.hbm [shape: bf16[7680,128], index: 1, kind: input, shape index: {}]   ;;  %s7851_s2 = inlined_call_operand.hbm [shape: f32[1,128], index: 2, kind: input, shape index: {}]   ;;  %s7852_s3 = inlined_call_operand.vmem [shape: f32[128,64], index: 3, kind: input, shape index: {}]   ;;  %s7853_s4 = inlined_call_operand.hbm [shape: f32[1,64], index: 4, kind: input, shape index: {}]   ;;  %s7854_s5 = inlined_call_operand.hbm [shape: f32[64,128], index: 5, kind: input, shape index: {}]   ;;  %s7855_s6 = inlined_call_operand.hbm [shape: f32[1,128], index: 6, kind: input, shape index: {}]   ;;  %s7856_s7 = inlined_call_operand.hbm [shape: f32[8,128], index: 7, kind: output, shape index: {}]  }
   0x1   :  { %13 = vsyncpa [#allocation6], 0 }
   0x2   :  { %14 = vsyncpa [#allocation9], 0 }
   0x3   :  { %15 = vsyncpa [#allocation12], 0 }
   0x4   :  { %16 = vsyncpa [#allocation4], 0  ;;  %s7630_s24 = smov [#allocation5]   ;;  %s7466_s28 = scalar_lea.hbm %s7850_s1, 61440 }
   0x5   :  { %s32_s25 = sshll.u32 %s7630_s24, 4  ;;  %p7467_p0 = scmp.ne.s32.totalorder %s7850_s1, %s7466_s28  ;;  %s33_s25 = int_to_ptr.vmem [resolvable:$true] %s32_s25 }
   0x6   :  { %p7470_p1 = scmp.lt.u32.totalorder %s7466_s28, %s7850_s1 }
   0x8   :  { %p7472_p2 = pnand %p7470_p1, %p7467_p0 }
   0xa   :  { %7475 = shalt.err (!%p7472_p2)
}
   0xb   :  { %s7476_s10 = scalar_lea.vmem %s33_s25, 61440  ;;  %p7481_p4 = scmp.lt.s32.totalorder %s33_s25, %s33_s25 }
   0xc   :  { %p7477_p3 = scmp.ne.s32.totalorder %s33_s25, %s7476_s10  ;;  %p7482_p5 = scmp.lt.s32.totalorder %s7476_s10, %s7476_s10 }
   0xe   :  { %p7483_p6 = por %p7482_p5, %p7481_p4 }
  0x10   :  { %p7484_p7 = pnand %p7483_p6, %p7477_p3 }
  0x12   :  { %7487 = shalt.err (!%p7484_p7)
}
  0x13   :  { %s7631_s11 = smov 64   ;;  %s7632_s12 = smov 4  }
  0x14   :  { %38 = dma.hbm_to_vmem [thread:$0]  %s7850_s1, 61440, %s33_s25, [#allocation6], %s7631_s11, %s7631_s11, %s7632_s12  }
  0x15   :  { %s7633_s15 = smov [#allocation8]   ;;  %s7634_s17 = smov [#allocation2]  }
  0x16   :  { %s57_s16 = sshll.u32 %s7633_s15, 4  ;;  %s23_s18 = sshll.u32 %s7634_s17, 4  ;;  %s58_s16 = int_to_ptr.vmem [resolvable:$true] %s57_s16  ;;  %s24_s18 = int_to_ptr.vmem [resolvable:$true] %s23_s18 }
  0x17   :  { %s7488_s21 = scalar_lea.hbm %s7853_s4, 16 }
  0x18   :  { %p7489_p8 = scmp.ne.s32.totalorder %s7853_s4, %s7488_s21  ;;  %p7492_p9 = scmp.lt.u32.totalorder %s7488_s21, %s7853_s4 }
  0x1a   :  { %p7494_p10 = pnand %p7492_p9, %p7489_p8 }
  0x1c   :  { %7497 = shalt.err (!%p7494_p10)
}
  0x1d   :  { %s7498_s1 = scalar_lea.vmem %s58_s16, 16  ;;  %s7502_s25 = scalar_lea.vmem %s58_s16, 32 }
  0x1e   :  { %p7499_p11 = scmp.ne.s32.totalorder %s58_s16, %s7498_s1  ;;  %p7503_p12 = scmp.lt.s32.totalorder %s58_s16, %s58_s16 }
  0x1f   :  { %p7504_p13 = scmp.lt.s32.totalorder %s7502_s25, %s7498_s1 }
  0x21   :  { %p7505_p0 = por %p7504_p13, %p7503_p12 }
  0x23   :  { %p7506_p1 = pnand %p7505_p0, %p7499_p11 }
  0x25   :  { %7509 = shalt.err (!%p7506_p1)
}
  0x26   :  { %60 = dma.hbm_to_vmem [thread:$0]  %s7853_s4, 16, %s58_s16, [#allocation9]  }
  0x27   :  { %s7510_s8 = scalar_lea.hbm %s7849_s0, 3840 }
  0x28   :  { %p7511_p2 = scmp.ne.s32.totalorder %s7849_s0, %s7510_s8  ;;  %p7514_p3 = scmp.lt.u32.totalorder %s7510_s8, %s7849_s0 }
  0x2a   :  { %p7516_p4 = pnand %p7514_p3, %p7511_p2 }
  0x2c   :  { %7519 = shalt.err (!%p7516_p4)
}
  0x2d   :  { %s7520_s13 = scalar_lea.vmem %s24_s18, 3840  ;;  %p7525_p6 = scmp.lt.s32.totalorder %s24_s18, %s24_s18 }
  0x2e   :  { %p7521_p5 = scmp.ne.s32.totalorder %s24_s18, %s7520_s13  ;;  %p7526_p7 = scmp.lt.s32.totalorder %s7520_s13, %s7520_s13 }
  0x30   :  { %p7527_p8 = por %p7526_p7, %p7525_p6 }
  0x32   :  { %p7528_p9 = pnand %p7527_p8, %p7521_p5 }
  0x34   :  { %7531 = shalt.err (!%p7528_p9)
}
  0x35   :  { %26 = dma.hbm_to_vmem [thread:$0]  %s7849_s0, 3840, %s24_s18, [#allocation3]  }
  0x36   :  { %s7635_s15 = smov [#allocation7]   ;;  %s7636_s17 = smov [#allocation10]  }
  0x37   :  { %s45_s16 = sshll.u32 %s7635_s15, 4  ;;  %s66_s19 = sshll.u32 %s7636_s17, 4  ;;  %s46_s16 = int_to_ptr.vmem [resolvable:$true] %s45_s16  ;;  %s67_s19 = int_to_ptr.vmem [resolvable:$true] %s66_s19 }
  0x38   :  { %s7532_s22 = scalar_lea.hbm %s7851_s2, 16 }
  0x39   :  { %p7533_p10 = scmp.ne.s32.totalorder %s7851_s2, %s7532_s22  ;;  %p7536_p11 = scmp.lt.u32.totalorder %s7532_s22, %s7851_s2 }
  0x3b   :  { %p7538_p12 = pnand %p7536_p11, %p7533_p10 }
  0x3d   :  { %7541 = shalt.err (!%p7538_p12)
}
  0x3e   :  { %s7542_s0 = scalar_lea.vmem %s46_s16, 16  ;;  %s7546_s18 = scalar_lea.vmem %s46_s16, 32 }
  0x3f   :  { %p7543_p13 = scmp.ne.s32.totalorder %s46_s16, %s7542_s0  ;;  %p7547_p0 = scmp.lt.s32.totalorder %s46_s16, %s46_s16 }
  0x40   :  { %p7548_p1 = scmp.lt.s32.totalorder %s7546_s18, %s7542_s0 }
  0x42   :  { %p7549_p2 = por %p7548_p1, %p7547_p0 }
  0x44   :  { %p7550_p3 = pnand %p7549_p2, %p7543_p13 }
  0x46   :  { %7553 = shalt.err (!%p7550_p3)
}
  0x47   :  { %48 = dma.hbm_to_vmem [thread:$0]  %s7851_s2, 16, %s46_s16, [#allocation6]  }
  0x48   :  { %s7554_s30 = scalar_lea.hbm %s7854_s5, 1024 }
  0x49   :  { %p7555_p4 = scmp.ne.s32.totalorder %s7854_s5, %s7554_s30  ;;  %p7558_p5 = scmp.lt.u32.totalorder %s7554_s30, %s7854_s5 }
  0x4b   :  { %p7560_p6 = pnand %p7558_p5, %p7555_p4 }
  0x4d   :  { %7563 = shalt.err (!%p7560_p6)
}
  0x4e   :  { %s7564_s12 = scalar_lea.vmem %s67_s19, 1024  ;;  %p7569_p8 = scmp.lt.s32.totalorder %s67_s19, %s67_s19 }
  0x4f   :  { %p7565_p7 = scmp.ne.s32.totalorder %s67_s19, %s7564_s12  ;;  %p7570_p9 = scmp.lt.s32.totalorder %s7564_s12, %s7564_s12 }
  0x51   :  { %p7571_p10 = por %p7570_p9, %p7569_p8 }
  0x53   :  { %p7572_p11 = pnand %p7571_p10, %p7565_p7 }
  0x55   :  { %7575 = shalt.err (!%p7572_p11)
}
  0x56   :  { %s7637_s2 = smov 128   ;;  %s7638_s13 = smov 8  }
  0x57   :  { %72 = dma.hbm_to_vmem [thread:$0]  %s7854_s5, 1024, %s67_s19, [#allocation9], %s7637_s2, %s7637_s2, %s7638_s13  }
  0x58   :  { %s7639_s15 = smov [#allocation11]   ;;  %s7576_s21 = scalar_lea.hbm %s7855_s6, 16 }
  0x59   :  { %s79_s16 = sshll.u32 %s7639_s15, 4  ;;  %p7577_p12 = scmp.ne.s32.totalorder %s7855_s6, %s7576_s21  ;;  %s80_s16 = int_to_ptr.vmem [resolvable:$true] %s79_s16 }
  0x5a   :  { %p7580_p13 = scmp.lt.u32.totalorder %s7576_s21, %s7855_s6 }
  0x5c   :  { %p7582_p0 = pnand %p7580_p13, %p7577_p12 }
  0x5e   :  { %7585 = shalt.err (!%p7582_p0)
}
  0x5f   :  { %s7586_s1 = scalar_lea.vmem %s80_s16, 16  ;;  %s7590_s5 = scalar_lea.vmem %s80_s16, 32 }
  0x60   :  { %p7587_p1 = scmp.ne.s32.totalorder %s80_s16, %s7586_s1  ;;  %p7591_p2 = scmp.lt.s32.totalorder %s80_s16, %s80_s16 }
  0x61   :  { %p7592_p3 = scmp.lt.s32.totalorder %s7590_s5, %s7586_s1 }
  0x63   :  { %p7593_p4 = por %p7592_p3, %p7591_p2 }
  0x65   :  { %p7594_p5 = pnand %p7593_p4, %p7587_p1 }
  0x67   :  { %7597 = shalt.err (!%p7594_p5)
}
  0x68   :  { %82 = dma.hbm_to_vmem [thread:$0]  %s7855_s6, 16, %s80_s16, [#allocation12]  }
  0x69   :  { %7620 = dma.done.wait [#allocation3], 3840  }
  0x6a   :  { %7621 = vsyncadd [#allocation3], 4294963456 }
  0x6b   :  { %7622 = dma.done.wait [#allocation6], 61456  }
  0x6c   :  { %7623 = vsyncadd [#allocation6], 4294905840 }
  0x6d   :  { %7624 = dma.done.wait [#allocation9], 1040  }
  0x6e   :  { %7625 = vsyncadd [#allocation9], 4294966256 }
  0x6f   :  { %7626 = dma.done.wait [#allocation12], 16  }
  0x70   :  { %7627 = vsyncadd [#allocation12], 4294967280  ;;  %v6926_v0 = vld [vmem:[#allocation5 + $0x40] sm:$0xff]   ;;  %v6930_v4 = vld [vmem:[#allocation5 + $0x48] sm:$0xff]   ;;  %vm7641_vm0 = vmmov 0   ;;  %vm5499_vm1 = vcmask 523264  }
  0x71   :  { %v6927_v1 = vld [vmem:[#allocation5 + $0xc0] sm:$0xff]   ;;  %6136 = vmatprep.subr.bf16.mxu0 %v6926_v0  ;;  %v6931_v5 = vld [vmem:[#allocation5 + $0xc8] sm:$0xff]   ;;  %v6934_v8 = vld [vmem:[#allocation5 + $0x50] sm:$0xff]  }
  0x72   :  { %v6928_v2 = vld [vmem:[#allocation5] sm:$0xff]   ;;  %6158 = vmatprep.subr.bf16.mxu1 %v6927_v1  ;;  %v6932_v6 = vld [vmem:[#allocation5 + $0x8] sm:$0xff]   ;;  %v6935_v9 = vld [vmem:[#allocation5 + $0xd0] sm:$0xff]  }
  0x73   :  { %v6929_v3 = vld [vmem:[#allocation5 + $0x80] sm:$0xff]   ;;  %6137 = vmatpush3.bf16.msra.mxu0 %v6928_v2  ;;  %v6933_v7 = vld [vmem:[#allocation5 + $0x88] sm:$0xff]   ;;  %v6936_v10 = vld [vmem:[#allocation5 + $0x10] sm:$0xff]  }
  0x74   :  { %6159 = vmatpush3.bf16.msra.mxu1 %v6929_v3  ;;  %6138 = vmatprep.subr.bf16.mxu0 %v6930_v4  ;;  %v6937_v11 = vld [vmem:[#allocation5 + $0x90] sm:$0xff]   ;;  %v6938_v12 = vld [vmem:[#allocation5 + $0x58] sm:$0xff]   ;;  %v6942_v16 = vld [vmem:[#allocation5 + $0x60] sm:$0xff]  }
  0x75   :  { %6160 = vmatprep.subr.bf16.mxu1 %v6931_v5  ;;  %v6939_v13 = vld [vmem:[#allocation5 + $0xd8] sm:$0xff]   ;;  %v6943_v17 = vld [vmem:[#allocation5 + $0xe0] sm:$0xff]   ;;  %v6946_v20 = vld [vmem:[#allocation5 + $0x68] sm:$0xff]  }
  0x76   :  { %v6940_v14 = vld [vmem:[#allocation5 + $0x18] sm:$0xff]   ;;  %v6944_v18 = vld [vmem:[#allocation5 + $0x20] sm:$0xff]   ;;  %v6947_v21 = vld [vmem:[#allocation5 + $0xe8] sm:$0xff]  }
  0x77   :  { %6139 = vmatpush3.bf16.msra.mxu0 %v6932_v6  ;;  %v6941_v15 = vld [vmem:[#allocation5 + $0x98] sm:$0xff]   ;;  %v6945_v19 = vld [vmem:[#allocation5 + $0xa0] sm:$0xff]   ;;  %v6948_v22 = vld [vmem:[#allocation5 + $0x28] sm:$0xff]  }
  0x78   :  { %6161 = vmatpush3.bf16.msra.mxu1 %v6933_v7  ;;  %6140 = vmatprep.subr.bf16.mxu0 %v6934_v8  ;;  %v6949_v23 = vld [vmem:[#allocation5 + $0xa8] sm:$0xff]   ;;  %v6950_v24 = vld [vmem:[#allocation5 + $0x70] sm:$0xff]   ;;  %v6954_v28 = vld [vmem:[#allocation5 + $0x78] sm:$0xff]  }
  0x79   :  { %6162 = vmatprep.subr.bf16.mxu1 %v6935_v9  ;;  %v6951_v25 = vld [vmem:[#allocation5 + $0xf0] sm:$0xff]   ;;  %v6955_v29 = vld [vmem:[#allocation5 + $0xf8] sm:$0xff]   ;;  %v6962_v38 = vld [vmem:[#allocation5 + $0x140] sm:$0xff]  }
  0x7a   :  { %v6952_v26 = vld [vmem:[#allocation5 + $0x30] sm:$0xff]   ;;  %v6956_v30 = vld [vmem:[#allocation5 + $0x38] sm:$0xff]   ;;  %v6963_v39 = vld [vmem:[#allocation5 + $0x1c0] sm:$0xff]  }
  0x7b   :  { %6141 = vmatpush3.bf16.msra.mxu0 %v6936_v10  ;;  %v6953_v27 = vld [vmem:[#allocation5 + $0xb0] sm:$0xff]   ;;  %v6957_v31 = vld [vmem:[#allocation5 + $0xb8] sm:$0xff]   ;;  %v6964_v40 = vld [vmem:[#allocation5 + $0x100] sm:$0xff]  }
  0x7c   :  { %6163 = vmatpush3.bf16.msra.mxu1 %v6937_v11  ;;  %6142 = vmatprep.subr.bf16.mxu0 %v6938_v12  ;;  %v102_v32 = vld [vmem:[#allocation2] sm:$0xff]  ;;  %v103_v33 = vld [vmem:[#allocation2 + $0x8] sm:$0xff]  ;;  %v6965_v41 = vld [vmem:[#allocation5 + $0x180] sm:$0xff]  }
  0x7d   :  { %6164 = vmatprep.subr.bf16.mxu1 %v6939_v13  ;;  %v5593_v34 = vcombine.low %v102_v32, %v102_v32  ;;  %v5594_v35 = vcombine.high %v102_v32, %v102_v32  ;;  %v5595_v36 = vcombine.low %v103_v33, %v103_v33  ;;  %v5596_v37 = vcombine.high %v103_v33, %v103_v33  ;;  %v6966_v42 = vld [vmem:[#allocation5 + $0x148] sm:$0xff]   ;;  %v6970_v46 = vld [vmem:[#allocation5 + $0x150] sm:$0xff]   ;;  %v6974_v50 = vld [vmem:[#allocation5 + $0x158] sm:$0xff]  }
  0x7e   :  { %v6967_v43 = vld [vmem:[#allocation5 + $0x1c8] sm:$0xff]   ;;  %v6971_v47 = vld [vmem:[#allocation5 + $0x1d0] sm:$0xff]   ;;  %v6975_v51 = vld [vmem:[#allocation5 + $0x1d8] sm:$0xff]  }
  0x7f   :  { %6143 = vmatpush3.bf16.msra.mxu0 %v6940_v14  ;;  %4221 = vmatprep.mubr.bf16.mxu0 %v5594_v35  ;;  %v6968_v44 = vld [vmem:[#allocation5 + $0x108] sm:$0xff]   ;;  %v6972_v48 = vld [vmem:[#allocation5 + $0x110] sm:$0xff]   ;;  %v6976_v52 = vld [vmem:[#allocation5 + $0x118] sm:$0xff]  }
  0x80   :  { %6165 = vmatpush3.bf16.msra.mxu1 %v6941_v15  ;;  %6144 = vmatprep.subr.bf16.mxu0 %v6942_v16  ;;  %v6969_v45 = vld [vmem:[#allocation5 + $0x188] sm:$0xff]   ;;  %v6973_v49 = vld [vmem:[#allocation5 + $0x190] sm:$0xff]   ;;  %v6977_v53 = vld [vmem:[#allocation5 + $0x198] sm:$0xff]  }
  0x81   :  { %6166 = vmatprep.subr.bf16.mxu1 %v6943_v17  ;;  %4261 = vmatprep.mubr.bf16.mxu1 %v5596_v37  ;;  %v6978_v54 = vld [vmem:[#allocation5 + $0x160] sm:$0xff]   ;;  %v6982_v58 = vld [vmem:[#allocation5 + $0x168] sm:$0xff]   ;;  %v6986_v62 = vld [vmem:[#allocation5 + $0x170] sm:$0xff]  }
  0x82   :  { %v6979_v55 = vld [vmem:[#allocation5 + $0x1e0] sm:$0xff]   ;;  %v6983_v59 = vld [vmem:[#allocation5 + $0x1e8] sm:$0xff]   ;;  %v6987_v63 = vld [vmem:[#allocation5 + $0x1f0] sm:$0xff]  }
  0x83   :  { %6145 = vmatpush3.bf16.msra.mxu0 %v6944_v18  ;;  %v6980_v56 = vld [vmem:[#allocation5 + $0x120] sm:$0xff]   ;;  %v6984_v60 = vld [vmem:[#allocation5 + $0x128] sm:$0xff]   ;;  %v6988_v0 = vld [vmem:[#allocation5 + $0x130] sm:$0xff]  }
  0x84   :  { %6167 = vmatpush3.bf16.msra.mxu1 %v6945_v19  ;;  %6146 = vmatprep.subr.bf16.mxu0 %v6946_v20  ;;  %v6981_v57 = vld [vmem:[#allocation5 + $0x1a0] sm:$0xff]   ;;  %v6985_v61 = vld [vmem:[#allocation5 + $0x1a8] sm:$0xff]   ;;  %v6989_v1 = vld [vmem:[#allocation5 + $0x1b0] sm:$0xff]  }
  0x85   :  { %6168 = vmatprep.subr.bf16.mxu1 %v6947_v21  ;;  %v6990_v2 = vld [vmem:[#allocation5 + $0x178] sm:$0xff]   ;;  %v104_v6 = vld [vmem:[#allocation2 + $0x10] sm:$0xff]  ;;  %v105_v9 = vld [vmem:[#allocation2 + $0x18] sm:$0xff] }
  0x86   :  { %v6991_v3 = vld [vmem:[#allocation5 + $0x1f8] sm:$0xff]   ;;  %v5597_v7 = vcombine.low %v104_v6, %v104_v6  ;;  %v5598_v8 = vcombine.high %v104_v6, %v104_v6  ;;  %v5599_v10 = vcombine.low %v105_v9, %v105_v9  ;;  %v5600_v11 = vcombine.high %v105_v9, %v105_v9  ;;  %v6998_v12 = vld [vmem:[#allocation5 + $0x240] sm:$0xff]   ;;  %v7002_v16 = vld [vmem:[#allocation5 + $0x248] sm:$0xff]  }
  0x87   :  { %6147 = vmatpush3.bf16.msra.mxu0 %v6948_v22  ;;  %v6992_v4 = vld [vmem:[#allocation5 + $0x138] sm:$0xff]   ;;  %v6999_v13 = vld [vmem:[#allocation5 + $0x2c0] sm:$0xff]   ;;  %v7003_v17 = vld [vmem:[#allocation5 + $0x2c8] sm:$0xff]  }
  0x88   :  { %6169 = vmatpush3.bf16.msra.mxu1 %v6949_v23  ;;  %6148 = vmatprep.subr.bf16.mxu0 %v6950_v24  ;;  %v6993_v5 = vld [vmem:[#allocation5 + $0x1b8] sm:$0xff]   ;;  %v7000_v14 = vld [vmem:[#allocation5 + $0x200] sm:$0xff]   ;;  %v7004_v18 = vld [vmem:[#allocation5 + $0x208] sm:$0xff]  }
  0x89   :  { %6170 = vmatprep.subr.bf16.mxu1 %v6951_v25  ;;  %v7001_v15 = vld [vmem:[#allocation5 + $0x280] sm:$0xff]   ;;  %v7005_v19 = vld [vmem:[#allocation5 + $0x288] sm:$0xff]   ;;  %v7006_v20 = vld [vmem:[#allocation5 + $0x250] sm:$0xff]  }
  0x8a   :  { %v7007_v21 = vld [vmem:[#allocation5 + $0x2d0] sm:$0xff]   ;;  %v7010_v24 = vld [vmem:[#allocation5 + $0x258] sm:$0xff]   ;;  %v7018_v32 = vld [vmem:[#allocation5 + $0x268] sm:$0xff]  }
  0x8b   :  { %6149 = vmatpush3.bf16.msra.mxu0 %v6952_v26  ;;  %v7008_v22 = vld [vmem:[#allocation5 + $0x210] sm:$0xff]   ;;  %v7011_v25 = vld [vmem:[#allocation5 + $0x2d8] sm:$0xff]   ;;  %v7019_v33 = vld [vmem:[#allocation5 + $0x2e8] sm:$0xff]  }
  0x8c   :  { %6171 = vmatpush3.bf16.msra.mxu1 %v6953_v27  ;;  %6150 = vmatprep.subr.bf16.mxu0 %v6954_v28  ;;  %v7009_v23 = vld [vmem:[#allocation5 + $0x290] sm:$0xff]   ;;  %v7012_v26 = vld [vmem:[#allocation5 + $0x218] sm:$0xff]   ;;  %v7014_v28 = vld [vmem:[#allocation5 + $0x260] sm:$0xff]  }
  0x8d   :  { %6172 = vmatprep.subr.bf16.mxu1 %v6955_v29  ;;  %v7013_v27 = vld [vmem:[#allocation5 + $0x298] sm:$0xff]   ;;  %v7015_v29 = vld [vmem:[#allocation5 + $0x2e0] sm:$0xff]   ;;  %v7021_v35 = vld [vmem:[#allocation5 + $0x2a8] sm:$0xff]  }
  0x8e   :  { %v7023_v37 = vld [vmem:[#allocation5 + $0x2f0] sm:$0xff]   ;;  %v7054_v6 = vld [vmem:[#allocation5 + $0x368] sm:$0xff]  }
  0x8f   :  { %6151 = vmatpush3.bf16.msra.mxu0 %v6956_v30  ;;  %v7016_v30 = vld [vmem:[#allocation5 + $0x220] sm:$0xff]   ;;  %v7057_v9 = vld [vmem:[#allocation5 + $0x3a8] sm:$0xff]  }
  0x90   :  { %6173 = vmatpush3.bf16.msra.mxu1 %v6957_v31  ;;  %6180 = vmatprep.subr.bf16.mxu0 %v6962_v38  ;;  %v7017_v31 = vld [vmem:[#allocation5 + $0x2a0] sm:$0xff]   ;;  %v7024_v38 = vld [vmem:[#allocation5 + $0x230] sm:$0xff]  }
  0x91   :  { %6202 = vmatprep.subr.bf16.mxu1 %v6963_v39  ;;  %v7025_v39 = vld [vmem:[#allocation5 + $0x2b0] sm:$0xff]  }
  0x92   :  { %4222 = vmatmul.mubr.bf16.vlgmr.msra.gmra.mrb[0].mxu0 %v5593_v34  ;;  %v7020_v34 = vld [vmem:[#allocation5 + $0x228] sm:$0xff]  }
  0x93   :  { %4262 = vmatmul.mubr.bf16.vlgmr.msra.gmra.mrb[0].mxu1 %v5595_v36  ;;  %6181 = vmatpush3.bf16.msra.mxu0 %v6964_v40  ;;  %v7022_v36 = vld [vmem:[#allocation5 + $0x270] sm:$0xff]   ;;  %v7026_v40 = vld [vmem:[#allocation5 + $0x278] sm:$0xff]  }
  0x94   :  { %6203 = vmatpush3.bf16.msra.mxu1 %v6965_v41  ;;  %6182 = vmatprep.subr.bf16.mxu0 %v6966_v42  ;;  %v7027_v41 = vld [vmem:[#allocation5 + $0x2f8] sm:$0xff]  }
  0x95   :  { %6204 = vmatprep.subr.bf16.mxu1 %v6967_v43  ;;  %4301 = vmatprep.mubr.bf16.mxu0 %v5598_v8  ;;  %v7028_v42 = vld [vmem:[#allocation5 + $0x238] sm:$0xff]   ;;  %v7056_v8 = vld [vmem:[#allocation5 + $0x328] sm:$0xff]  }
  0x96   :  { %4341 = vmatprep.mubr.bf16.mxu1 %v5600_v11  ;;  %v7029_v43 = vld [vmem:[#allocation5 + $0x2b8] sm:$0xff]   ;;  %v7059_v11 = vld [vmem:[#allocation5 + $0x3f0] sm:$0xff]  }
  0x97   :  { %6183 = vmatpush3.bf16.msra.mxu0 %v6968_v44  ;;  %v106_v44 = vld [vmem:[#allocation2 + $0x20] sm:$0xff] }
  0x98   :  { %6205 = vmatpush3.bf16.msra.mxu1 %v6969_v45  ;;  %6184 = vmatprep.subr.bf16.mxu0 %v6970_v46  ;;  %v107_v45 = vld [vmem:[#allocation2 + $0x28] sm:$0xff]  ;;  %v5601_v46 = vcombine.low %v106_v44, %v106_v44 }
  0x99   :  { %6206 = vmatprep.subr.bf16.mxu1 %v6971_v47  ;;  %v5602_v47 = vcombine.high %v106_v44, %v106_v44  ;;  %v7090_v44 = vld [vmem:[#allocation5 + $0x468] sm:$0xff]  }
  0x9b   :  { %6185 = vmatpush3.bf16.msra.mxu0 %v6972_v48  ;;  %v5603_v48 = vcombine.low %v107_v45, %v107_v45 }
  0x9c   :  { %6207 = vmatpush3.bf16.msra.mxu1 %v6973_v49  ;;  %6186 = vmatprep.subr.bf16.mxu0 %v6974_v50  ;;  %v5604_v49 = vcombine.high %v107_v45, %v107_v45  ;;  %v7034_v50 = vld [vmem:[#allocation5 + $0x340] sm:$0xff]   ;;  %v7091_v45 = vld [vmem:[#allocation5 + $0x4e8] sm:$0xff]  }
  0x9d   :  { %6208 = vmatprep.subr.bf16.mxu1 %v6975_v51  ;;  %v7035_v51 = vld [vmem:[#allocation5 + $0x3c0] sm:$0xff]  }
  0x9f   :  { %6187 = vmatpush3.bf16.msra.mxu0 %v6976_v52  ;;  %v7036_v52 = vld [vmem:[#allocation5 + $0x300] sm:$0xff]  }
  0xa0   :  { %6209 = vmatpush3.bf16.msra.mxu1 %v6977_v53  ;;  %6188 = vmatprep.subr.bf16.mxu0 %v6978_v54  ;;  %v7037_v53 = vld [vmem:[#allocation5 + $0x380] sm:$0xff]   ;;  %v7038_v54 = vld [vmem:[#allocation5 + $0x348] sm:$0xff]  }
  0xa1   :  { %6210 = vmatprep.subr.bf16.mxu1 %v6979_v55  ;;  %v7039_v55 = vld [vmem:[#allocation5 + $0x3c8] sm:$0xff]  }
  0xa3   :  { %6189 = vmatpush3.bf16.msra.mxu0 %v6980_v56  ;;  %v7040_v56 = vld [vmem:[#allocation5 + $0x308] sm:$0xff]  }
  0xa4   :  { %6211 = vmatpush3.bf16.msra.mxu1 %v6981_v57  ;;  %6190 = vmatprep.subr.bf16.mxu0 %v6982_v58  ;;  %v7041_v57 = vld [vmem:[#allocation5 + $0x388] sm:$0xff]   ;;  %v7042_v58 = vld [vmem:[#allocation5 + $0x350] sm:$0xff]  }
  0xa5   :  { %6212 = vmatprep.subr.bf16.mxu1 %v6983_v59  ;;  %v7043_v59 = vld [vmem:[#allocation5 + $0x3d0] sm:$0xff]  }
  0xa7   :  { %6191 = vmatpush3.bf16.msra.mxu0 %v6984_v60  ;;  %v7044_v60 = vld [vmem:[#allocation5 + $0x310] sm:$0xff]  }
  0xa8   :  { %6213 = vmatpush3.bf16.msra.mxu1 %v6985_v61  ;;  %6192 = vmatprep.subr.bf16.mxu0 %v6986_v62  ;;  %v7045_v61 = vld [vmem:[#allocation5 + $0x390] sm:$0xff]   ;;  %v7046_v62 = vld [vmem:[#allocation5 + $0x358] sm:$0xff]  }
  0xa9   :  { %6214 = vmatprep.subr.bf16.mxu1 %v6987_v63  ;;  %v7047_v63 = vld [vmem:[#allocation5 + $0x3d8] sm:$0xff]  }
  0xab   :  { %6193 = vmatpush3.bf16.msra.mxu0 %v6988_v0  ;;  %v7048_v0 = vld [vmem:[#allocation5 + $0x318] sm:$0xff]  }
  0xac   :  { %6215 = vmatpush3.bf16.msra.mxu1 %v6989_v1  ;;  %6194 = vmatprep.subr.bf16.mxu0 %v6990_v2  ;;  %v7049_v1 = vld [vmem:[#allocation5 + $0x398] sm:$0xff]   ;;  %v7050_v2 = vld [vmem:[#allocation5 + $0x360] sm:$0xff]  }
  0xad   :  { %6216 = vmatprep.subr.bf16.mxu1 %v6991_v3  ;;  %v7051_v3 = vld [vmem:[#allocation5 + $0x3e0] sm:$0xff]  }
  0xaf   :  { %6195 = vmatpush3.bf16.msra.mxu0 %v6992_v4  ;;  %v7052_v4 = vld [vmem:[#allocation5 + $0x320] sm:$0xff]  }
  0xb0   :  { %6217 = vmatpush3.bf16.msra.mxu1 %v6993_v5  ;;  %6224 = vmatprep.subr.bf16.mxu0 %v6998_v12  ;;  %v7053_v5 = vld [vmem:[#allocation5 + $0x3a0] sm:$0xff]   ;;  %v7060_v12 = vld [vmem:[#allocation5 + $0x330] sm:$0xff]  }
  0xb1   :  { %6246 = vmatprep.subr.bf16.mxu1 %v6999_v13  ;;  %v7061_v13 = vld [vmem:[#allocation5 + $0x3b0] sm:$0xff]  }
  0xb2   :  { %4302 = vmatmul.mubr.bf16.vlgmr.msra.gmra.mrb[4].mxu0 %v5597_v7  ;;  %v7055_v7 = vld [vmem:[#allocation5 + $0x3e8] sm:$0xff]  }
  0xb3   :  { %4342 = vmatmul.mubr.bf16.vlgmr.msra.gmra.mrb[4].mxu1 %v5599_v10  ;;  %6225 = vmatpush3.bf16.msra.mxu0 %v7000_v14  ;;  %v7058_v10 = vld [vmem:[#allocation5 + $0x370] sm:$0xff]   ;;  %v7062_v14 = vld [vmem:[#allocation5 + $0x378] sm:$0xff]  }
  0xb4   :  { %6247 = vmatpush3.bf16.msra.mxu1 %v7001_v15  ;;  %6226 = vmatprep.subr.bf16.mxu0 %v7002_v16  ;;  %v7063_v15 = vld [vmem:[#allocation5 + $0x3f8] sm:$0xff]  }
  0xb5   :  { %6248 = vmatprep.subr.bf16.mxu1 %v7003_v17  ;;  %4381 = vmatprep.mubr.bf16.mxu0 %v5602_v47  ;;  %v7064_v16 = vld [vmem:[#allocation5 + $0x338] sm:$0xff]   ;;  %v7093_v47 = vld [vmem:[#allocation5 + $0x4a8] sm:$0xff]  }
  0xb6   :  { %4421 = vmatprep.mubr.bf16.mxu1 %v5604_v49  ;;  %v7065_v17 = vld [vmem:[#allocation5 + $0x3b8] sm:$0xff]   ;;  %v7095_v49 = vld [vmem:[#allocation5 + $0x4f0] sm:$0xff]  }
  0xb7   :  { %6227 = vmatpush3.bf16.msra.mxu0 %v7004_v18  ;;  %v108_v18 = vld [vmem:[#allocation2 + $0x30] sm:$0xff] }
  0xb8   :  { %6249 = vmatpush3.bf16.msra.mxu1 %v7005_v19  ;;  %6228 = vmatprep.subr.bf16.mxu0 %v7006_v20  ;;  %v109_v19 = vld [vmem:[#allocation2 + $0x38] sm:$0xff]  ;;  %v5605_v20 = vcombine.low %v108_v18, %v108_v18 }
  0xb9   :  { %6250 = vmatprep.subr.bf16.mxu1 %v7007_v21  ;;  %v5606_v21 = vcombine.high %v108_v18, %v108_v18  ;;  %v7126_v18 = vld [vmem:[#allocation5 + $0x568] sm:$0xff]  }
  0xbb   :  { %6229 = vmatpush3.bf16.msra.mxu0 %v7008_v22  ;;  %v5607_v22 = vcombine.low %v109_v19, %v109_v19 }
  0xbc   :  { %6251 = vmatpush3.bf16.msra.mxu1 %v7009_v23  ;;  %6230 = vmatprep.subr.bf16.mxu0 %v7010_v24  ;;  %v7070_v23 = vld [vmem:[#allocation5 + $0x440] sm:$0xff]   ;;  %v5608_v24 = vcombine.high %v109_v19, %v109_v19  ;;  %v7127_v19 = vld [vmem:[#allocation5 + $0x5e8] sm:$0xff]  }
  0xbd   :  { %6252 = vmatprep.subr.bf16.mxu1 %v7011_v25  ;;  %v7071_v25 = vld [vmem:[#allocation5 + $0x4c0] sm:$0xff]  }
  0xbf   :  { %6231 = vmatpush3.bf16.msra.mxu0 %v7012_v26  ;;  %v7072_v26 = vld [vmem:[#allocation5 + $0x400] sm:$0xff]  }
  0xc0   :  { %6253 = vmatpush3.bf16.msra.mxu1 %v7013_v27  ;;  %6232 = vmatprep.subr.bf16.mxu0 %v7014_v28  ;;  %v7073_v27 = vld [vmem:[#allocation5 + $0x480] sm:$0xff]   ;;  %v7074_v28 = vld [vmem:[#allocation5 + $0x448] sm:$0xff]  }
  0xc1   :  { %6254 = vmatprep.subr.bf16.mxu1 %v7015_v29  ;;  %v7075_v29 = vld [vmem:[#allocation5 + $0x4c8] sm:$0xff]  }
  0xc3   :  { %6233 = vmatpush3.bf16.msra.mxu0 %v7016_v30  ;;  %v7076_v30 = vld [vmem:[#allocation5 + $0x408] sm:$0xff]  }
  0xc4   :  { %6255 = vmatpush3.bf16.msra.mxu1 %v7017_v31  ;;  %6234 = vmatprep.subr.bf16.mxu0 %v7018_v32  ;;  %v7077_v31 = vld [vmem:[#allocation5 + $0x488] sm:$0xff]   ;;  %v7078_v32 = vld [vmem:[#allocation5 + $0x450] sm:$0xff]  }
  0xc5   :  { %6256 = vmatprep.subr.bf16.mxu1 %v7019_v33  ;;  %v7079_v33 = vld [vmem:[#allocation5 + $0x4d0] sm:$0xff]  }
  0xc7   :  { %6235 = vmatpush3.bf16.msra.mxu0 %v7020_v34  ;;  %v7080_v34 = vld [vmem:[#allocation5 + $0x410] sm:$0xff]  }
  0xc8   :  { %6257 = vmatpush3.bf16.msra.mxu1 %v7021_v35  ;;  %6236 = vmatprep.subr.bf16.mxu0 %v7022_v36  ;;  %v7081_v35 = vld [vmem:[#allocation5 + $0x490] sm:$0xff]   ;;  %v7082_v36 = vld [vmem:[#allocation5 + $0x458] sm:$0xff]  }
  0xc9   :  { %6258 = vmatprep.subr.bf16.mxu1 %v7023_v37  ;;  %v7083_v37 = vld [vmem:[#allocation5 + $0x4d8] sm:$0xff]  }
  0xcb   :  { %6237 = vmatpush3.bf16.msra.mxu0 %v7024_v38  ;;  %v7084_v38 = vld [vmem:[#allocation5 + $0x418] sm:$0xff]  }
  0xcc   :  { %6259 = vmatpush3.bf16.msra.mxu1 %v7025_v39  ;;  %6238 = vmatprep.subr.bf16.mxu0 %v7026_v40  ;;  %v7085_v39 = vld [vmem:[#allocation5 + $0x498] sm:$0xff]   ;;  %v7086_v40 = vld [vmem:[#allocation5 + $0x460] sm:$0xff]  }
  0xcd   :  { %6260 = vmatprep.subr.bf16.mxu1 %v7027_v41  ;;  %v7087_v41 = vld [vmem:[#allocation5 + $0x4e0] sm:$0xff]  }
  0xcf   :  { %6239 = vmatpush3.bf16.msra.mxu0 %v7028_v42  ;;  %v7088_v42 = vld [vmem:[#allocation5 + $0x420] sm:$0xff]  }
  0xd0   :  { %6261 = vmatpush3.bf16.msra.mxu1 %v7029_v43  ;;  %6268 = vmatprep.subr.bf16.mxu0 %v7034_v50  ;;  %v7089_v43 = vld [vmem:[#allocation5 + $0x4a0] sm:$0xff]   ;;  %v7096_v50 = vld [vmem:[#allocation5 + $0x430] sm:$0xff]  }
  0xd1   :  { %6290 = vmatprep.subr.bf16.mxu1 %v7035_v51  ;;  %v7097_v51 = vld [vmem:[#allocation5 + $0x4b0] sm:$0xff]  }
  0xd2   :  { %4382 = vmatmul.mubr.bf16.vlgmr.msra.gmra.mrb[8].mxu0 %v5601_v46  ;;  %v7092_v46 = vld [vmem:[#allocation5 + $0x428] sm:$0xff]  }
  0xd3   :  { %4422 = vmatmul.mubr.bf16.vlgmr.msra.gmra.mrb[8].mxu1 %v5603_v48  ;;  %6269 = vmatpush3.bf16.msra.mxu0 %v7036_v52  ;;  %v7094_v48 = vld [vmem:[#allocation5 + $0x470] sm:$0xff]   ;;  %v7098_v52 = vld [vmem:[#allocation5 + $0x478] sm:$0xff]  }
  0xd4   :  { %6291 = vmatpush3.bf16.msra.mxu1 %v7037_v53  ;;  %6270 = vmatprep.subr.bf16.mxu0 %v7038_v54  ;;  %v7099_v53 = vld [vmem:[#allocation5 + $0x4f8] sm:$0xff]  }
  0xd5   :  { %6292 = vmatprep.subr.bf16.mxu1 %v7039_v55  ;;  %4461 = vmatprep.mubr.bf16.mxu0 %v5606_v21  ;;  %v7100_v54 = vld [vmem:[#allocation5 + $0x438] sm:$0xff]   ;;  %v7129_v21 = vld [vmem:[#allocation5 + $0x5a8] sm:$0xff]  }
  0xd6   :  { %4501 = vmatprep.mubr.bf16.mxu1 %v5608_v24  ;;  %v7101_v55 = vld [vmem:[#allocation5 + $0x4b8] sm:$0xff]   ;;  %v7132_v24 = vld [vmem:[#allocation5 + $0x530] sm:$0xff]  }
  0xd7   :  { %6271 = vmatpush3.bf16.msra.mxu0 %v7040_v56  ;;  %v110_v56 = vld [vmem:[#allocation2 + $0x40] sm:$0xff] }
  0xd8   :  { %6293 = vmatpush3.bf16.msra.mxu1 %v7041_v57  ;;  %6272 = vmatprep.subr.bf16.mxu0 %v7042_v58  ;;  %v5609_v57 = vcombine.low %v110_v56, %v110_v56  ;;  %v5610_v58 = vcombine.high %v110_v56, %v110_v56  ;;  %v7162_v56 = vld [vmem:[#allocation5 + $0x668] sm:$0xff]  }
  0xd9   :  { %6294 = vmatprep.subr.bf16.mxu1 %v7043_v59  ;;  %v111_v59 = vld [vmem:[#allocation2 + $0x48] sm:$0xff] }
  0xdb   :  { %6273 = vmatpush3.bf16.msra.mxu0 %v7044_v60  ;;  %v5611_v60 = vcombine.low %v111_v59, %v111_v59 }
  0xdc   :  { %6295 = vmatpush3.bf16.msra.mxu1 %v7045_v61  ;;  %6274 = vmatprep.subr.bf16.mxu0 %v7046_v62  ;;  %v5612_v61 = vcombine.high %v111_v59, %v111_v59  ;;  %v7106_v62 = vld [vmem:[#allocation5 + $0x540] sm:$0xff]   ;;  %v7165_v59 = vld [vmem:[#allocation5 + $0x6a8] sm:$0xff]  }
  0xdd   :  { %6296 = vmatprep.subr.bf16.mxu1 %v7047_v63  ;;  %v7107_v63 = vld [vmem:[#allocation5 + $0x5c0] sm:$0xff]  }
  0xdf   :  { %6275 = vmatpush3.bf16.msra.mxu0 %v7048_v0  ;;  %v7108_v0 = vld [vmem:[#allocation5 + $0x500] sm:$0xff]  }
  0xe0   :  { %6297 = vmatpush3.bf16.msra.mxu1 %v7049_v1  ;;  %6276 = vmatprep.subr.bf16.mxu0 %v7050_v2  ;;  %v7109_v1 = vld [vmem:[#allocation5 + $0x580] sm:$0xff]   ;;  %v7110_v2 = vld [vmem:[#allocation5 + $0x548] sm:$0xff]  }
  0xe1   :  { %6298 = vmatprep.subr.bf16.mxu1 %v7051_v3  ;;  %v7111_v3 = vld [vmem:[#allocation5 + $0x5c8] sm:$0xff]  }
  0xe3   :  { %6277 = vmatpush3.bf16.msra.mxu0 %v7052_v4  ;;  %v7112_v4 = vld [vmem:[#allocation5 + $0x508] sm:$0xff]  }
  0xe4   :  { %6299 = vmatpush3.bf16.msra.mxu1 %v7053_v5  ;;  %6278 = vmatprep.subr.bf16.mxu0 %v7054_v6  ;;  %v7113_v5 = vld [vmem:[#allocation5 + $0x588] sm:$0xff]   ;;  %v7114_v6 = vld [vmem:[#allocation5 + $0x550] sm:$0xff]  }
  0xe5   :  { %6300 = vmatprep.subr.bf16.mxu1 %v7055_v7  ;;  %v7115_v7 = vld [vmem:[#allocation5 + $0x5d0] sm:$0xff]  }
  0xe7   :  { %6279 = vmatpush3.bf16.msra.mxu0 %v7056_v8  ;;  %v7116_v8 = vld [vmem:[#allocation5 + $0x510] sm:$0xff]  }
  0xe8   :  { %6301 = vmatpush3.bf16.msra.mxu1 %v7057_v9  ;;  %6280 = vmatprep.subr.bf16.mxu0 %v7058_v10  ;;  %v7117_v9 = vld [vmem:[#allocation5 + $0x590] sm:$0xff]   ;;  %v7118_v10 = vld [vmem:[#allocation5 + $0x558] sm:$0xff]  }
  0xe9   :  { %6302 = vmatprep.subr.bf16.mxu1 %v7059_v11  ;;  %v7119_v11 = vld [vmem:[#allocation5 + $0x5d8] sm:$0xff]  }
  0xeb   :  { %6281 = vmatpush3.bf16.msra.mxu0 %v7060_v12  ;;  %v7120_v12 = vld [vmem:[#allocation5 + $0x518] sm:$0xff]  }
  0xec   :  { %6303 = vmatpush3.bf16.msra.mxu1 %v7061_v13  ;;  %6282 = vmatprep.subr.bf16.mxu0 %v7062_v14  ;;  %v7121_v13 = vld [vmem:[#allocation5 + $0x598] sm:$0xff]   ;;  %v7122_v14 = vld [vmem:[#allocation5 + $0x560] sm:$0xff]  }
  0xed   :  { %6304 = vmatprep.subr.bf16.mxu1 %v7063_v15  ;;  %v7123_v15 = vld [vmem:[#allocation5 + $0x5e0] sm:$0xff]  }
  0xef   :  { %6283 = vmatpush3.bf16.msra.mxu0 %v7064_v16  ;;  %v7124_v16 = vld [vmem:[#allocation5 + $0x520] sm:$0xff]  }
  0xf0   :  { %6305 = vmatpush3.bf16.msra.mxu1 %v7065_v17  ;;  %6312 = vmatprep.subr.bf16.mxu0 %v7070_v23  ;;  %v7125_v17 = vld [vmem:[#allocation5 + $0x5a0] sm:$0xff]   ;;  %v7131_v23 = vld [vmem:[#allocation5 + $0x5f0] sm:$0xff]  }
  0xf1   :  { %6334 = vmatprep.subr.bf16.mxu1 %v7071_v25  ;;  %v7133_v25 = vld [vmem:[#allocation5 + $0x5b0] sm:$0xff]  }
  0xf2   :  { %4462 = vmatmul.mubr.bf16.vlgmr.msra.gmra.mrb[12].mxu0 %v5605_v20  ;;  %v7128_v20 = vld [vmem:[#allocation5 + $0x528] sm:$0xff]  }
  0xf3   :  { %4502 = vmatmul.mubr.bf16.vlgmr.msra.gmra.mrb[12].mxu1 %v5607_v22  ;;  %6313 = vmatpush3.bf16.msra.mxu0 %v7072_v26  ;;  %v7130_v22 = vld [vmem:[#allocation5 + $0x570] sm:$0xff]   ;;  %v7134_v26 = vld [vmem:[#allocation5 + $0x578] sm:$0xff]  }
  0xf4   :  { %6335 = vmatpush3.bf16.msra.mxu1 %v7073_v27  ;;  %6314 = vmatprep.subr.bf16.mxu0 %v7074_v28  ;;  %v7135_v27 = vld [vmem:[#allocation5 + $0x5f8] sm:$0xff]  }
  0xf5   :  { %6336 = vmatprep.subr.bf16.mxu1 %v7075_v29  ;;  %4541 = vmatprep.mubr.bf16.mxu0 %v5610_v58  ;;  %v7136_v28 = vld [vmem:[#allocation5 + $0x538] sm:$0xff]   ;;  %v7164_v58 = vld [vmem:[#allocation5 + $0x628] sm:$0xff]  }
  0xf6   :  { %4581 = vmatprep.mubr.bf16.mxu1 %v5612_v61  ;;  %v7137_v29 = vld [vmem:[#allocation5 + $0x5b8] sm:$0xff]   ;;  %v7167_v61 = vld [vmem:[#allocation5 + $0x6f0] sm:$0xff]  }
  0xf7   :  { %6315 = vmatpush3.bf16.msra.mxu0 %v7076_v30  ;;  %v112_v30 = vld [vmem:[#allocation2 + $0x50] sm:$0xff] }
  0xf8   :  { %6337 = vmatpush3.bf16.msra.mxu1 %v7077_v31  ;;  %6316 = vmatprep.subr.bf16.mxu0 %v7078_v32  ;;  %v113_v31 = vld [vmem:[#allocation2 + $0x58] sm:$0xff]  ;;  %v5613_v32 = vcombine.low %v112_v30, %v112_v30 }
  0xf9   :  { %6338 = vmatprep.subr.bf16.mxu1 %v7079_v33  ;;  %v5614_v33 = vcombine.high %v112_v30, %v112_v30  ;;  %v7197_v30 = vld [vmem:[#allocation5 + $0x7a0] sm:$0xff]  }
  0xfb   :  { %6317 = vmatpush3.bf16.msra.mxu0 %v7080_v34  ;;  %v5615_v34 = vcombine.low %v113_v31, %v113_v31 }
  0xfc   :  { %6339 = vmatpush3.bf16.msra.mxu1 %v7081_v35  ;;  %6318 = vmatprep.subr.bf16.mxu0 %v7082_v36  ;;  %v5616_v35 = vcombine.high %v113_v31, %v113_v31  ;;  %v7142_v36 = vld [vmem:[#allocation5 + $0x640] sm:$0xff]  }
  0xfd   :  { %6340 = vmatprep.subr.bf16.mxu1 %v7083_v37  ;;  %v7143_v37 = vld [vmem:[#allocation5 + $0x6c0] sm:$0xff]  }
  0xff   :  { %6319 = vmatpush3.bf16.msra.mxu0 %v7084_v38  ;;  %v7144_v38 = vld [vmem:[#allocation5 + $0x600] sm:$0xff]  }
 0x100   :  { %6341 = vmatpush3.bf16.msra.mxu1 %v7085_v39  ;;  %6320 = vmatprep.subr.bf16.mxu0 %v7086_v40  ;;  %v7145_v39 = vld [vmem:[#allocation5 + $0x680] sm:$0xff]   ;;  %v7146_v40 = vld [vmem:[#allocation5 + $0x648] sm:$0xff]  }
 0x101   :  { %6342 = vmatprep.subr.bf16.mxu1 %v7087_v41  ;;  %v7147_v41 = vld [vmem:[#allocation5 + $0x6c8] sm:$0xff]  }
 0x103   :  { %6321 = vmatpush3.bf16.msra.mxu0 %v7088_v42  ;;  %v7148_v42 = vld [vmem:[#allocation5 + $0x608] sm:$0xff]  }
 0x104   :  { %6343 = vmatpush3.bf16.msra.mxu1 %v7089_v43  ;;  %6322 = vmatprep.subr.bf16.mxu0 %v7090_v44  ;;  %v7149_v43 = vld [vmem:[#allocation5 + $0x688] sm:$0xff]   ;;  %v7150_v44 = vld [vmem:[#allocation5 + $0x650] sm:$0xff]  }
 0x105   :  { %6344 = vmatprep.subr.bf16.mxu1 %v7091_v45  ;;  %v7151_v45 = vld [vmem:[#allocation5 + $0x6d0] sm:$0xff]  }
 0x107   :  { %6323 = vmatpush3.bf16.msra.mxu0 %v7092_v46  ;;  %v7152_v46 = vld [vmem:[#allocation5 + $0x610] sm:$0xff]  }
 0x108   :  { %6345 = vmatpush3.bf16.msra.mxu1 %v7093_v47  ;;  %6324 = vmatprep.subr.bf16.mxu0 %v7094_v48  ;;  %v7153_v47 = vld [vmem:[#allocation5 + $0x690] sm:$0xff]   ;;  %v7154_v48 = vld [vmem:[#allocation5 + $0x658] sm:$0xff]  }
 0x109   :  { %6346 = vmatprep.subr.bf16.mxu1 %v7095_v49  ;;  %v7155_v49 = vld [vmem:[#allocation5 + $0x6d8] sm:$0xff]  }
 0x10b   :  { %6325 = vmatpush3.bf16.msra.mxu0 %v7096_v50  ;;  %v7156_v50 = vld [vmem:[#allocation5 + $0x618] sm:$0xff]  }
 0x10c   :  { %6347 = vmatpush3.bf16.msra.mxu1 %v7097_v51  ;;  %6326 = vmatprep.subr.bf16.mxu0 %v7098_v52  ;;  %v7157_v51 = vld [vmem:[#allocation5 + $0x698] sm:$0xff]   ;;  %v7158_v52 = vld [vmem:[#allocation5 + $0x660] sm:$0xff]  }
 0x10d   :  { %6348 = vmatprep.subr.bf16.mxu1 %v7099_v53  ;;  %v7159_v53 = vld [vmem:[#allocation5 + $0x6e0] sm:$0xff]  }
 0x10f   :  { %6327 = vmatpush3.bf16.msra.mxu0 %v7100_v54  ;;  %v7160_v54 = vld [vmem:[#allocation5 + $0x620] sm:$0xff]  }
 0x110   :  { %6349 = vmatpush3.bf16.msra.mxu1 %v7101_v55  ;;  %6356 = vmatprep.subr.bf16.mxu0 %v7106_v62  ;;  %v7161_v55 = vld [vmem:[#allocation5 + $0x6a0] sm:$0xff]   ;;  %v7168_v62 = vld [vmem:[#allocation5 + $0x630] sm:$0xff]  }
 0x111   :  { %6378 = vmatprep.subr.bf16.mxu1 %v7107_v63  ;;  %v7169_v63 = vld [vmem:[#allocation5 + $0x6b0] sm:$0xff]  }
 0x112   :  { %4542 = vmatmul.mubr.bf16.vlgmr.msra.gmra.mrb[16].mxu0 %v5609_v57  ;;  %v7163_v57 = vld [vmem:[#allocation5 + $0x6e8] sm:$0xff]  }
 0x113   :  { %4582 = vmatmul.mubr.bf16.vlgmr.msra.gmra.mrb[16].mxu1 %v5611_v60  ;;  %6357 = vmatpush3.bf16.msra.mxu0 %v7108_v0  ;;  %v7166_v60 = vld [vmem:[#allocation5 + $0x670] sm:$0xff]   ;;  %v7170_v0 = vld [vmem:[#allocation5 + $0x678] sm:$0xff]  }
 0x114   :  { %6379 = vmatpush3.bf16.msra.mxu1 %v7109_v1  ;;  %6358 = vmatprep.subr.bf16.mxu0 %v7110_v2  ;;  %v7171_v1 = vld [vmem:[#allocation5 + $0x6f8] sm:$0xff]  }
 0x115   :  { %6380 = vmatprep.subr.bf16.mxu1 %v7111_v3  ;;  %4621 = vmatprep.mubr.bf16.mxu0 %v5614_v33  ;;  %v7172_v2 = vld [vmem:[#allocation5 + $0x638] sm:$0xff]  }
 0x116   :  { %4661 = vmatprep.mubr.bf16.mxu1 %v5616_v35  ;;  %v7173_v3 = vld [vmem:[#allocation5 + $0x6b8] sm:$0xff]  }
 0x117   :  { %6359 = vmatpush3.bf16.msra.mxu0 %v7112_v4  ;;  %v114_v4 = vld [vmem:[#allocation2 + $0x60] sm:$0xff] }
 0x118   :  { %6381 = vmatpush3.bf16.msra.mxu1 %v7113_v5  ;;  %6360 = vmatprep.subr.bf16.mxu0 %v7114_v6  ;;  %v115_v5 = vld [vmem:[#allocation2 + $0x68] sm:$0xff]  ;;  %v5617_v6 = vcombine.low %v114_v4, %v114_v4 }
 0x119   :  { %6382 = vmatprep.subr.bf16.mxu1 %v7115_v7  ;;  %v5618_v7 = vcombine.high %v114_v4, %v114_v4  ;;  %v7221_v4 = vld [vmem:[#allocation5 + $0x888] sm:$0xff]  }
 0x11b   :  { %6361 = vmatpush3.bf16.msra.mxu0 %v7116_v8  ;;  %v5619_v8 = vcombine.low %v115_v5, %v115_v5 }
 0x11c   :  { %6383 = vmatpush3.bf16.msra.mxu1 %v7117_v9  ;;  %6362 = vmatprep.subr.bf16.mxu0 %v7118_v10  ;;  %v7178_v9 = vld [vmem:[#allocation5 + $0x740] sm:$0xff]   ;;  %v5620_v10 = vcombine.high %v115_v5, %v115_v5  ;;  %v7222_v5 = vld [vmem:[#allocation5 + $0x850] sm:$0xff]  }
 0x11d   :  { %6384 = vmatprep.subr.bf16.mxu1 %v7119_v11  ;;  %v7179_v11 = vld [vmem:[#allocation5 + $0x7c0] sm:$0xff]  }
 0x11f   :  { %6363 = vmatpush3.bf16.msra.mxu0 %v7120_v12  ;;  %v7180_v12 = vld [vmem:[#allocation5 + $0x700] sm:$0xff]  }
 0x120   :  { %6385 = vmatpush3.bf16.msra.mxu1 %v7121_v13  ;;  %6364 = vmatprep.subr.bf16.mxu0 %v7122_v14  ;;  %v7181_v13 = vld [vmem:[#allocation5 + $0x780] sm:$0xff]   ;;  %v7182_v14 = vld [vmem:[#allocation5 + $0x748] sm:$0xff]  }
 0x121   :  { %6386 = vmatprep.subr.bf16.mxu1 %v7123_v15  ;;  %v7183_v15 = vld [vmem:[#allocation5 + $0x7c8] sm:$0xff]  }
 0x123   :  { %6365 = vmatpush3.bf16.msra.mxu0 %v7124_v16  ;;  %v7184_v16 = vld [vmem:[#allocation5 + $0x708] sm:$0xff]  }
 0x124   :  { %6387 = vmatpush3.bf16.msra.mxu1 %v7125_v17  ;;  %6366 = vmatprep.subr.bf16.mxu0 %v7126_v18  ;;  %v7185_v17 = vld [vmem:[#allocation5 + $0x788] sm:$0xff]   ;;  %v7186_v18 = vld [vmem:[#allocation5 + $0x750] sm:$0xff]  }
 0x125   :  { %6388 = vmatprep.subr.bf16.mxu1 %v7127_v19  ;;  %v7187_v19 = vld [vmem:[#allocation5 + $0x7d0] sm:$0xff]  }
 0x127   :  { %6367 = vmatpush3.bf16.msra.mxu0 %v7128_v20  ;;  %v7188_v20 = vld [vmem:[#allocation5 + $0x710] sm:$0xff]  }
 0x128   :  { %6389 = vmatpush3.bf16.msra.mxu1 %v7129_v21  ;;  %6368 = vmatprep.subr.bf16.mxu0 %v7130_v22  ;;  %v7189_v21 = vld [vmem:[#allocation5 + $0x790] sm:$0xff]   ;;  %v7190_v22 = vld [vmem:[#allocation5 + $0x758] sm:$0xff]  }
 0x129   :  { %6390 = vmatprep.subr.bf16.mxu1 %v7131_v23  ;;  %v7191_v23 = vld [vmem:[#allocation5 + $0x7d8] sm:$0xff]  }
 0x12b   :  { %6369 = vmatpush3.bf16.msra.mxu0 %v7132_v24  ;;  %v7192_v24 = vld [vmem:[#allocation5 + $0x718] sm:$0xff]  }
 0x12c   :  { %6391 = vmatpush3.bf16.msra.mxu1 %v7133_v25  ;;  %6370 = vmatprep.subr.bf16.mxu0 %v7134_v26  ;;  %v7193_v25 = vld [vmem:[#allocation5 + $0x798] sm:$0xff]   ;;  %v7194_v26 = vld [vmem:[#allocation5 + $0x760] sm:$0xff]  }
 0x12d   :  { %6392 = vmatprep.subr.bf16.mxu1 %v7135_v27  ;;  %v7195_v27 = vld [vmem:[#allocation5 + $0x7e0] sm:$0xff]  }
 0x12f   :  { %6371 = vmatpush3.bf16.msra.mxu0 %v7136_v28  ;;  %v7196_v28 = vld [vmem:[#allocation5 + $0x720] sm:$0xff]  }
 0x130   :  { %6393 = vmatpush3.bf16.msra.mxu1 %v7137_v29  ;;  %6400 = vmatprep.subr.bf16.mxu0 %v7142_v36 }
 0x131   :  { %6422 = vmatprep.subr.bf16.mxu1 %v7143_v37  ;;  %v7198_v37 = vld [vmem:[#allocation5 + $0x768] sm:$0xff]  }
 0x132   :  { %4622 = vmatmul.mubr.bf16.vlgmr.msra.gmra.mrb[20].mxu0 %v5613_v32  ;;  %v5592_v32 = vld [vmem:[#allocation7] ss:$0 sm:$0xff] }
 0x133   :  { %4662 = vmatmul.mubr.bf16.vlgmr.msra.gmra.mrb[20].mxu1 %v5615_v34  ;;  %6401 = vmatpush3.bf16.msra.mxu0 %v7144_v38 }
 0x134   :  { %6423 = vmatpush3.bf16.msra.mxu1 %v7145_v39  ;;  %6402 = vmatprep.subr.bf16.mxu0 %v7146_v40  ;;  %v7199_v39 = vld [vmem:[#allocation5 + $0x7e8] sm:$0xff]  }
 0x135   :  { %6424 = vmatprep.subr.bf16.mxu1 %v7147_v41  ;;  %4701 = vmatprep.mubr.bf16.mxu0 %v5618_v7  ;;  %v7224_v7 = vld [vmem:[#allocation5 + $0x810] sm:$0xff]  }
 0x136   :  { %4741 = vmatprep.mubr.bf16.mxu1 %v5620_v10  ;;  %v7227_v10 = vld [vmem:[#allocation5 + $0x8d8] sm:$0xff]  }
 0x137   :  { %6403 = vmatpush3.bf16.msra.mxu0 %v7148_v42  ;;  %v7200_v42 = vld [vmem:[#allocation5 + $0x728] sm:$0xff]  }
 0x138   :  { %6425 = vmatpush3.bf16.msra.mxu1 %v7149_v43  ;;  %6404 = vmatprep.subr.bf16.mxu0 %v7150_v44  ;;  %v7201_v44 = vld [vmem:[#allocation5 + $0x7a8] sm:$0xff]  }
 0x139   :  { %6426 = vmatprep.subr.bf16.mxu1 %v7151_v45 }
 0x13b   :  { %6405 = vmatpush3.bf16.msra.mxu0 %v7152_v46 }
 0x13c   :  { %6427 = vmatpush3.bf16.msra.mxu1 %v7153_v47  ;;  %6406 = vmatprep.subr.bf16.mxu0 %v7154_v48  ;;  %v7202_v47 = vld [vmem:[#allocation5 + $0x770] sm:$0xff]  }
 0x13d   :  { %6428 = vmatprep.subr.bf16.mxu1 %v7155_v49  ;;  %v7203_v48 = vld [vmem:[#allocation5 + $0x7f0] sm:$0xff]  }
 0x13e   :  { %v7204_v49 = vld [vmem:[#allocation5 + $0x730] sm:$0xff]  }
 0x13f   :  { %6407 = vmatpush3.bf16.msra.mxu0 %v7156_v50  ;;  %v7205_v50 = vld [vmem:[#allocation5 + $0x7b0] sm:$0xff]  }
 0x140   :  { %6429 = vmatpush3.bf16.msra.mxu1 %v7157_v51  ;;  %6408 = vmatprep.subr.bf16.mxu0 %v7158_v52  ;;  %v7206_v51 = vld [vmem:[#allocation5 + $0x778] sm:$0xff]  }
 0x141   :  { %6430 = vmatprep.subr.bf16.mxu1 %v7159_v53  ;;  %v7207_v52 = vld [vmem:[#allocation5 + $0x7f8] sm:$0xff]  }
 0x142   :  { %v7208_v53 = vld [vmem:[#allocation5 + $0x738] sm:$0xff]  }
 0x143   :  { %6409 = vmatpush3.bf16.msra.mxu0 %v7160_v54  ;;  %v7209_v54 = vld [vmem:[#allocation5 + $0x7b8] sm:$0xff]  }
 0x144   :  { %6431 = vmatpush3.bf16.msra.mxu1 %v7161_v55  ;;  %6410 = vmatprep.subr.bf16.mxu0 %v7162_v56  ;;  %v116_v55 = vld [vmem:[#allocation2 + $0x70] sm:$0xff]  ;;  %v117_v56 = vld [vmem:[#allocation2 + $0x78] sm:$0xff] }
 0x145   :  { %6432 = vmatprep.subr.bf16.mxu1 %v7163_v57  ;;  %v5621_v57 = vcombine.low %v116_v55, %v116_v55 }
 0x147   :  { %6411 = vmatpush3.bf16.msra.mxu0 %v7164_v58  ;;  %v5622_v58 = vcombine.high %v116_v55, %v116_v55  ;;  %v7258_v55 = vld [vmem:[#allocation5 + $0x950] sm:$0xff]  }
 0x148   :  { %6433 = vmatpush3.bf16.msra.mxu1 %v7165_v59  ;;  %6412 = vmatprep.subr.bf16.mxu0 %v7166_v60  ;;  %v5623_v59 = vcombine.low %v117_v56, %v117_v56  ;;  %v5624_v60 = vcombine.high %v117_v56, %v117_v56  ;;  %v7259_v56 = vld [vmem:[#allocation5 + $0x9d0] sm:$0xff]  }
 0x149   :  { %6434 = vmatprep.subr.bf16.mxu1 %v7167_v61  ;;  %v7214_v61 = vld [vmem:[#allocation5 + $0x840] sm:$0xff]  }
 0x14b   :  { %6413 = vmatpush3.bf16.msra.mxu0 %v7168_v62  ;;  %v7215_v62 = vld [vmem:[#allocation5 + $0x8c0] sm:$0xff]  }
 0x14c   :  { %6435 = vmatpush3.bf16.msra.mxu1 %v7169_v63  ;;  %6414 = vmatprep.subr.bf16.mxu0 %v7170_v0  ;;  %v7216_v63 = vld [vmem:[#allocation5 + $0x800] sm:$0xff]  }
 0x14d   :  { %6436 = vmatprep.subr.bf16.mxu1 %v7171_v1  ;;  %v7217_v0 = vld [vmem:[#allocation5 + $0x880] sm:$0xff]   ;;  %v7218_v1 = vld [vmem:[#allocation5 + $0x848] sm:$0xff]  }
 0x14f   :  { %6415 = vmatpush3.bf16.msra.mxu0 %v7172_v2  ;;  %v7219_v2 = vld [vmem:[#allocation5 + $0x8c8] sm:$0xff]  }
 0x150   :  { %6437 = vmatpush3.bf16.msra.mxu1 %v7173_v3  ;;  %6444 = vmatprep.subr.bf16.mxu0 %v7178_v9  ;;  %v7220_v3 = vld [vmem:[#allocation5 + $0x808] sm:$0xff]   ;;  %v7226_v9 = vld [vmem:[#allocation5 + $0x858] sm:$0xff]  }
 0x151   :  { %6466 = vmatprep.subr.bf16.mxu1 %v7179_v11  ;;  %v7228_v11 = vld [vmem:[#allocation5 + $0x818] sm:$0xff]  }
 0x152   :  { %4702 = vmatmul.mubr.bf16.vlgmr.msra.gmra.mrb[24].mxu0 %v5617_v6  ;;  %v7223_v6 = vld [vmem:[#allocation5 + $0x8d0] sm:$0xff]  }
 0x153   :  { %4742 = vmatmul.mubr.bf16.vlgmr.msra.gmra.mrb[24].mxu1 %v5619_v8  ;;  %6445 = vmatpush3.bf16.msra.mxu0 %v7180_v12  ;;  %v7225_v8 = vld [vmem:[#allocation5 + $0x890] sm:$0xff]   ;;  %v7229_v12 = vld [vmem:[#allocation5 + $0x898] sm:$0xff]  }
 0x154   :  { %6467 = vmatpush3.bf16.msra.mxu1 %v7181_v13  ;;  %6446 = vmatprep.subr.bf16.mxu0 %v7182_v14  ;;  %v7230_v13 = vld [vmem:[#allocation5 + $0x860] sm:$0xff]  }
 0x155   :  { %6468 = vmatprep.subr.bf16.mxu1 %v7183_v15  ;;  %4781 = vmatprep.mubr.bf16.mxu0 %v5622_v58  ;;  %v7231_v14 = vld [vmem:[#allocation5 + $0x8e0] sm:$0xff]   ;;  %v7261_v58 = vld [vmem:[#allocation5 + $0x990] sm:$0xff]  }
 0x156   :  { %4821 = vmatprep.mubr.bf16.mxu1 %v5624_v60  ;;  %v7232_v15 = vld [vmem:[#allocation5 + $0x820] sm:$0xff]   ;;  %v7263_v60 = vld [vmem:[#allocation5 + $0x9d8] sm:$0xff]  }
 0x157   :  { %6447 = vmatpush3.bf16.msra.mxu0 %v7184_v16 }
 0x158   :  { %6469 = vmatpush3.bf16.msra.mxu1 %v7185_v17  ;;  %6448 = vmatprep.subr.bf16.mxu0 %v7186_v18  ;;  %v7233_v17 = vld [vmem:[#allocation5 + $0x8a0] sm:$0xff]  }
 0x159   :  { %6470 = vmatprep.subr.bf16.mxu1 %v7187_v19 }
 0x15b   :  { %6449 = vmatpush3.bf16.msra.mxu0 %v7188_v20 }
 0x15c   :  { %6471 = vmatpush3.bf16.msra.mxu1 %v7189_v21  ;;  %6450 = vmatprep.subr.bf16.mxu0 %v7190_v22 }
 0x15d   :  { %6472 = vmatprep.subr.bf16.mxu1 %v7191_v23  ;;  %v7234_v23 = vld [vmem:[#allocation5 + $0x868] sm:$0xff]  }
 0x15f   :  { %6451 = vmatpush3.bf16.msra.mxu0 %v7192_v24 }
 0x160   :  { %6473 = vmatpush3.bf16.msra.mxu1 %v7193_v25  ;;  %6452 = vmatprep.subr.bf16.mxu0 %v7194_v26  ;;  %v7235_v25 = vld [vmem:[#allocation5 + $0x8e8] sm:$0xff]  }
 0x161   :  { %6474 = vmatprep.subr.bf16.mxu1 %v7195_v27 }
 0x163   :  { %6453 = vmatpush3.bf16.msra.mxu0 %v7196_v28  ;;  %v7236_v28 = vld [vmem:[#allocation5 + $0x828] sm:$0xff]  }
 0x164   :  { %6475 = vmatpush3.bf16.msra.mxu1 %v7197_v30  ;;  %6454 = vmatprep.subr.bf16.mxu0 %v7198_v37  ;;  %v7237_v30 = vld [vmem:[#allocation5 + $0x8a8] sm:$0xff]   ;;  %v7242_v37 = vld [vmem:[#allocation5 + $0x878] sm:$0xff]  }
 0x165   :  { %v6152_v29 = vpop.f32.mrb[0].mxu0  ;;  %6476 = vmatprep.subr.bf16.mxu1 %v7199_v39  ;;  %v7244_v39 = vld [vmem:[#allocation5 + $0x838] sm:$0xff]  }
 0x166   :  { %v6174_v31 = vpop.f32.mrb[0].mxu1  ;;  %v6153_v33 = vpop.f32.mrb[1].mxu0 }
 0x167   :  { %v6175_v34 = vpop.f32.mrb[1].mxu1  ;;  %v6154_v35 = vadd.f32 %v6153_v33, %v6152_v29  ;;  %v6155_v38 = vpop.f32.mrb[2].mxu0  ;;  %6455 = vmatpush3.bf16.msra.mxu0 %v7200_v42  ;;  %v7238_v33 = vld [vmem:[#allocation5 + $0x870] sm:$0xff]   ;;  %v119_v42 = vld [vmem:[#allocation2 + $0x88] sm:$0xff] }
 0x168   :  { %v6176_v36 = vadd.f32 %v6175_v34, %v6174_v31  ;;  %v6177_v40 = vpop.f32.mrb[2].mxu1  ;;  %v6156_v43 = vpop.f32.mrb[3].mxu0  ;;  %6477 = vmatpush3.bf16.msra.mxu1 %v7201_v44  ;;  %6456 = vmatprep.subr.bf16.mxu0 %v7202_v47  ;;  %v7239_v34 = vld [vmem:[#allocation5 + $0x8f0] sm:$0xff]   ;;  %v7243_v38 = vld [vmem:[#allocation5 + $0x8f8] sm:$0xff]   ;;  %v7250_v47 = vld [vmem:[#allocation5 + $0x940] sm:$0xff]  }
 0x169   :  { %v4224_v41 = vadd.f32 %v6154_v35, %v5592_v32  ;;  %v6178_v45 = vpop.f32.mrb[3].mxu1  ;;  %6478 = vmatprep.subr.bf16.mxu1 %v7203_v48  ;;  %v7240_v35 = vld [vmem:[#allocation5 + $0x830] sm:$0xff]   ;;  %v7245_v40 = vld [vmem:[#allocation5 + $0x8b8] sm:$0xff]   ;;  %v7251_v48 = vld [vmem:[#allocation5 + $0x9c0] sm:$0xff]  }
 0x16a   :  { %v5627_v45 = vcombine.low %v119_v42, %v119_v42 }
 0x16b   :  { %v7756_v46 = vadd.f32 %v6176_v36, %v4224_v41  ;;  %6457 = vmatpush3.bf16.msra.mxu0 %v7204_v49  ;;  %v7241_v36 = vld [vmem:[#allocation5 + $0x8b0] sm:$0xff]   ;;  %v7252_v49 = vld [vmem:[#allocation5 + $0x900] sm:$0xff]  }
 0x16c   :  { %6479 = vmatpush3.bf16.msra.mxu1 %v7205_v50  ;;  %6458 = vmatprep.subr.bf16.mxu0 %v7206_v51  ;;  %v118_v41 = vld [vmem:[#allocation2 + $0x80] sm:$0xff]  ;;  %v7253_v50 = vld [vmem:[#allocation5 + $0x980] sm:$0xff]   ;;  %v7254_v51 = vld [vmem:[#allocation5 + $0x948] sm:$0xff]  }
 0x16d   :  { %6480 = vmatprep.subr.bf16.mxu1 %v7207_v52  ;;  %v5625_v43 = vcombine.low %v118_v41, %v118_v41  ;;  %v5626_v44 = vcombine.high %v118_v41, %v118_v41  ;;  %v7255_v52 = vld [vmem:[#allocation5 + $0x9c8] sm:$0xff]   ;;  %v7294_v41 = vld [vmem:[#allocation5 + $0xa50] sm:$0xff]  }
 0x16f   :  { %6459 = vmatpush3.bf16.msra.mxu0 %v7208_v53  ;;  %v7256_v53 = vld [vmem:[#allocation5 + $0x908] sm:$0xff]  }
 0x170   :  { %6481 = vmatpush3.bf16.msra.mxu1 %v7209_v54  ;;  %6488 = vmatprep.subr.bf16.mxu0 %v7214_v61  ;;  %v7257_v54 = vld [vmem:[#allocation5 + $0x988] sm:$0xff]   ;;  %v7264_v61 = vld [vmem:[#allocation5 + $0x918] sm:$0xff]  }
 0x171   :  { %6510 = vmatprep.subr.bf16.mxu1 %v7215_v62  ;;  %v7265_v62 = vld [vmem:[#allocation5 + $0x998] sm:$0xff]  }
 0x172   :  { %4782 = vmatmul.mubr.bf16.vlgmr.msra.gmra.mrb[28].mxu0 %v5621_v57  ;;  %v7260_v57 = vld [vmem:[#allocation5 + $0x910] sm:$0xff]  }
 0x173   :  { %4822 = vmatmul.mubr.bf16.vlgmr.msra.gmra.mrb[28].mxu1 %v5623_v59  ;;  %6489 = vmatpush3.bf16.msra.mxu0 %v7216_v63  ;;  %v7262_v59 = vld [vmem:[#allocation5 + $0x958] sm:$0xff]   ;;  %v7266_v63 = vld [vmem:[#allocation5 + $0x960] sm:$0xff]  }
 0x174   :  { %6511 = vmatpush3.bf16.msra.mxu1 %v7217_v0  ;;  %6490 = vmatprep.subr.bf16.mxu0 %v7218_v1  ;;  %v7267_v0 = vld [vmem:[#allocation5 + $0x9e0] sm:$0xff]  }
 0x175   :  { %6512 = vmatprep.subr.bf16.mxu1 %v7219_v2  ;;  %4861 = vmatprep.mubr.bf16.mxu0 %v5626_v44  ;;  %v7268_v2 = vld [vmem:[#allocation5 + $0x920] sm:$0xff]   ;;  %v7297_v44 = vld [vmem:[#allocation5 + $0xa90] sm:$0xff]  }
 0x177   :  { %6491 = vmatpush3.bf16.msra.mxu0 %v7220_v3 }
 0x178   :  { %6513 = vmatpush3.bf16.msra.mxu1 %v7221_v4  ;;  %6492 = vmatprep.subr.bf16.mxu0 %v7222_v5  ;;  %v7269_v4 = vld [vmem:[#allocation5 + $0x9a0] sm:$0xff]  }
 0x179   :  { %6514 = vmatprep.subr.bf16.mxu1 %v7223_v6 }
 0x17b   :  { %6493 = vmatpush3.bf16.msra.mxu0 %v7224_v7 }
 0x17c   :  { %6515 = vmatpush3.bf16.msra.mxu1 %v7225_v8  ;;  %6494 = vmatprep.subr.bf16.mxu0 %v7226_v9  ;;  %v7270_v8 = vld [vmem:[#allocation5 + $0x968] sm:$0xff]  }
 0x17d   :  { %6516 = vmatprep.subr.bf16.mxu1 %v7227_v10  ;;  %v7271_v10 = vld [vmem:[#allocation5 + $0x9e8] sm:$0xff]  }
 0x17f   :  { %6495 = vmatpush3.bf16.msra.mxu0 %v7228_v11 }
 0x180   :  { %6517 = vmatpush3.bf16.msra.mxu1 %v7229_v12  ;;  %6496 = vmatprep.subr.bf16.mxu0 %v7230_v13 }
 0x181   :  { %6518 = vmatprep.subr.bf16.mxu1 %v7231_v14  ;;  %v7272_v14 = vld [vmem:[#allocation5 + $0x928] sm:$0xff]  }
 0x183   :  { %6497 = vmatpush3.bf16.msra.mxu0 %v7232_v15  ;;  %v7273_v15 = vld [vmem:[#allocation5 + $0x9a8] sm:$0xff]  }
 0x184   :  { %6519 = vmatpush3.bf16.msra.mxu1 %v7233_v17  ;;  %6498 = vmatprep.subr.bf16.mxu0 %v7234_v23  ;;  %v7278_v23 = vld [vmem:[#allocation5 + $0x978] sm:$0xff]  }
 0x185   :  { %v6196_v16 = vpop.f32.mrb[4].mxu0  ;;  %6520 = vmatprep.subr.bf16.mxu1 %v7235_v25  ;;  %v7280_v25 = vld [vmem:[#allocation5 + $0x938] sm:$0xff]  }
 0x186   :  { %v6218_v18 = vpop.f32.mrb[4].mxu1  ;;  %v6197_v19 = vpop.f32.mrb[5].mxu0 }
 0x187   :  { %v6219_v20 = vpop.f32.mrb[5].mxu1  ;;  %v6198_v21 = vadd.f32 %v6197_v19, %v6196_v16  ;;  %v6199_v24 = vpop.f32.mrb[6].mxu0  ;;  %6499 = vmatpush3.bf16.msra.mxu0 %v7236_v28  ;;  %v7274_v19 = vld [vmem:[#allocation5 + $0x970] sm:$0xff]   ;;  %v121_v28 = vld [vmem:[#allocation2 + $0x98] sm:$0xff] }
 0x188   :  { %v6220_v22 = vadd.f32 %v6219_v20, %v6218_v18  ;;  %v6221_v26 = vpop.f32.mrb[6].mxu1  ;;  %v6200_v29 = vpop.f32.mrb[7].mxu0  ;;  %6521 = vmatpush3.bf16.msra.mxu1 %v7237_v30  ;;  %6500 = vmatprep.subr.bf16.mxu0 %v7238_v33  ;;  %v7275_v20 = vld [vmem:[#allocation5 + $0x9f0] sm:$0xff]   ;;  %v7279_v24 = vld [vmem:[#allocation5 + $0x9f8] sm:$0xff]   ;;  %v5632_v33 = vcombine.high %v121_v28, %v121_v28 }
 0x189   :  { %v4304_v27 = vadd.f32 %v6198_v21, %v7756_v46  ;;  %v6222_v31 = vpop.f32.mrb[7].mxu1  ;;  %6522 = vmatprep.subr.bf16.mxu1 %v7239_v34  ;;  %v5628_v46 = vcombine.high %v119_v42, %v119_v42  ;;  %v7276_v21 = vld [vmem:[#allocation5 + $0x930] sm:$0xff]   ;;  %v7281_v26 = vld [vmem:[#allocation5 + $0x9b8] sm:$0xff]   ;;  %v7287_v34 = vld [vmem:[#allocation5 + $0xac0] sm:$0xff]  }
 0x18a   :  { %v5631_v31 = vcombine.low %v121_v28, %v121_v28  ;;  %v7295_v42 = vld [vmem:[#allocation5 + $0xad0] sm:$0xff]  }
 0x18b   :  { %v7759_v32 = vadd.f32 %v6220_v22, %v4304_v27  ;;  %6501 = vmatpush3.bf16.msra.mxu0 %v7240_v35  ;;  %4901 = vmatprep.mubr.bf16.mxu1 %v5628_v46  ;;  %v7277_v22 = vld [vmem:[#allocation5 + $0x9b0] sm:$0xff]   ;;  %v120_v27 = vld [vmem:[#allocation2 + $0x90] sm:$0xff]  ;;  %v7299_v46 = vld [vmem:[#allocation5 + $0xad8] sm:$0xff]  }
 0x18c   :  { %6523 = vmatpush3.bf16.msra.mxu1 %v7241_v36  ;;  %6502 = vmatprep.subr.bf16.mxu0 %v7242_v37  ;;  %v5629_v29 = vcombine.low %v120_v27, %v120_v27  ;;  %v5630_v30 = vcombine.high %v120_v27, %v120_v27  ;;  %v7288_v35 = vld [vmem:[#allocation5 + $0xa00] sm:$0xff]   ;;  %v7290_v37 = vld [vmem:[#allocation5 + $0xa48] sm:$0xff]   ;;  %v7330_v27 = vld [vmem:[#allocation5 + $0xb50] sm:$0xff]  }
 0x18d   :  { %6524 = vmatprep.subr.bf16.mxu1 %v7243_v38  ;;  %v7289_v36 = vld [vmem:[#allocation5 + $0xa80] sm:$0xff]   ;;  %v7291_v38 = vld [vmem:[#allocation5 + $0xac8] sm:$0xff]   ;;  %v7331_v28 = vld [vmem:[#allocation5 + $0xbd0] sm:$0xff]  }
 0x18f   :  { %6503 = vmatpush3.bf16.msra.mxu0 %v7244_v39  ;;  %v7292_v39 = vld [vmem:[#allocation5 + $0xa08] sm:$0xff]  }
 0x190   :  { %6525 = vmatpush3.bf16.msra.mxu1 %v7245_v40  ;;  %6532 = vmatprep.subr.bf16.mxu0 %v7250_v47  ;;  %v7293_v40 = vld [vmem:[#allocation5 + $0xa88] sm:$0xff]   ;;  %v7300_v47 = vld [vmem:[#allocation5 + $0xa18] sm:$0xff]  }
 0x191   :  { %6554 = vmatprep.subr.bf16.mxu1 %v7251_v48  ;;  %v7301_v48 = vld [vmem:[#allocation5 + $0xa98] sm:$0xff]  }
 0x192   :  { %4862 = vmatmul.mubr.bf16.vlgmr.msra.gmra.mrb[32].mxu0 %v5625_v43  ;;  %v7296_v43 = vld [vmem:[#allocation5 + $0xa10] sm:$0xff]  }
 0x193   :  { %4902 = vmatmul.mubr.bf16.vlgmr.msra.gmra.mrb[32].mxu1 %v5627_v45  ;;  %6533 = vmatpush3.bf16.msra.mxu0 %v7252_v49  ;;  %v7298_v45 = vld [vmem:[#allocation5 + $0xa58] sm:$0xff]   ;;  %v7302_v49 = vld [vmem:[#allocation5 + $0xa60] sm:$0xff]  }
 0x194   :  { %6555 = vmatpush3.bf16.msra.mxu1 %v7253_v50  ;;  %6534 = vmatprep.subr.bf16.mxu0 %v7254_v51  ;;  %v7303_v50 = vld [vmem:[#allocation5 + $0xae0] sm:$0xff]  }
 0x195   :  { %6556 = vmatprep.subr.bf16.mxu1 %v7255_v52  ;;  %4941 = vmatprep.mubr.bf16.mxu0 %v5630_v30  ;;  %v7304_v52 = vld [vmem:[#allocation5 + $0xa20] sm:$0xff]   ;;  %v7333_v30 = vld [vmem:[#allocation5 + $0xb90] sm:$0xff]  }
 0x196   :  { %4981 = vmatprep.mubr.bf16.mxu1 %v5632_v33  ;;  %v7336_v33 = vld [vmem:[#allocation5 + $0xb18] sm:$0xff]  }
 0x197   :  { %6535 = vmatpush3.bf16.msra.mxu0 %v7256_v53 }
 0x198   :  { %6557 = vmatpush3.bf16.msra.mxu1 %v7257_v54  ;;  %6536 = vmatprep.subr.bf16.mxu0 %v7258_v55  ;;  %v7305_v54 = vld [vmem:[#allocation5 + $0xaa0] sm:$0xff]  }
 0x199   :  { %6558 = vmatprep.subr.bf16.mxu1 %v7259_v56 }
 0x19b   :  { %6537 = vmatpush3.bf16.msra.mxu0 %v7260_v57  ;;  %v7306_v57 = vld [vmem:[#allocation5 + $0xa68] sm:$0xff]  }
 0x19c   :  { %6559 = vmatpush3.bf16.msra.mxu1 %v7261_v58  ;;  %6538 = vmatprep.subr.bf16.mxu0 %v7262_v59 }
 0x19d   :  { %6560 = vmatprep.subr.bf16.mxu1 %v7263_v60  ;;  %v7307_v60 = vld [vmem:[#allocation5 + $0xae8] sm:$0xff]  }
 0x19f   :  { %6539 = vmatpush3.bf16.msra.mxu0 %v7264_v61 }
 0x1a0   :  { %6561 = vmatpush3.bf16.msra.mxu1 %v7265_v62  ;;  %6540 = vmatprep.subr.bf16.mxu0 %v7266_v63  ;;  %v7308_v63 = vld [vmem:[#allocation5 + $0xa28] sm:$0xff]  }
 0x1a1   :  { %6562 = vmatprep.subr.bf16.mxu1 %v7267_v0 }
 0x1a3   :  { %6541 = vmatpush3.bf16.msra.mxu0 %v7268_v2 }
 0x1a4   :  { %6563 = vmatpush3.bf16.msra.mxu1 %v7269_v4  ;;  %6542 = vmatprep.subr.bf16.mxu0 %v7270_v8  ;;  %v7310_v4 = vld [vmem:[#allocation5 + $0xa70] sm:$0xff]  }
 0x1a5   :  { %v6240_v1 = vpop.f32.mrb[8].mxu0  ;;  %6564 = vmatprep.subr.bf16.mxu1 %v7271_v10  ;;  %v7313_v8 = vld [vmem:[#allocation5 + $0xab0] sm:$0xff]   ;;  %v7315_v10 = vld [vmem:[#allocation5 + $0xaf8] sm:$0xff]  }
 0x1a6   :  { %v6262_v3 = vpop.f32.mrb[8].mxu1  ;;  %v6241_v5 = vpop.f32.mrb[9].mxu0 }
 0x1a7   :  { %v6242_v6 = vadd.f32 %v6241_v5, %v6240_v1  ;;  %v6263_v7 = vpop.f32.mrb[9].mxu1  ;;  %v6243_v11 = vpop.f32.mrb[10].mxu0  ;;  %6543 = vmatpush3.bf16.msra.mxu0 %v7272_v14  ;;  %v7309_v1 = vld [vmem:[#allocation5 + $0xaa8] sm:$0xff]  }
 0x1a8   :  { %v6264_v9 = vadd.f32 %v6263_v7, %v6262_v3  ;;  %v6265_v13 = vpop.f32.mrb[10].mxu1  ;;  %v6244_v16 = vpop.f32.mrb[11].mxu0  ;;  %6565 = vmatpush3.bf16.msra.mxu1 %v7273_v15  ;;  %6544 = vmatprep.subr.bf16.mxu0 %v7274_v19  ;;  %v7312_v7 = vld [vmem:[#allocation5 + $0xa30] sm:$0xff]   ;;  %v7316_v11 = vld [vmem:[#allocation5 + $0xa38] sm:$0xff]   ;;  %v7322_v19 = vld [vmem:[#allocation5 + $0xb40] sm:$0xff]  }
 0x1a9   :  { %v4384_v12 = vadd.f32 %v6242_v6, %v7759_v32  ;;  %v6266_v18 = vpop.f32.mrb[11].mxu1  ;;  %6566 = vmatprep.subr.bf16.mxu1 %v7275_v20  ;;  %v7286_v32 = vld [vmem:[#allocation5 + $0xa40] sm:$0xff]   ;;  %v7311_v6 = vld [vmem:[#allocation5 + $0xaf0] sm:$0xff]   ;;  %v123_v16 = vld [vmem:[#allocation2 + $0xa8] sm:$0xff] }
 0x1aa   :  { %v122_v13 = vld [vmem:[#allocation2 + $0xa0] sm:$0xff]  ;;  %v5636_v18 = vcombine.high %v123_v16, %v123_v16  ;;  %v7323_v20 = vld [vmem:[#allocation5 + $0xbc0] sm:$0xff]  }
 0x1ab   :  { %v7762_v17 = vadd.f32 %v6264_v9, %v4384_v12  ;;  %6545 = vmatpush3.bf16.msra.mxu0 %v7276_v21  ;;  %v7314_v9 = vld [vmem:[#allocation5 + $0xa78] sm:$0xff]   ;;  %v5633_v14 = vcombine.low %v122_v13, %v122_v13  ;;  %v5634_v15 = vcombine.high %v122_v13, %v122_v13  ;;  %v7324_v21 = vld [vmem:[#allocation5 + $0xb00] sm:$0xff]   ;;  %v7366_v13 = vld [vmem:[#allocation5 + $0xc50] sm:$0xff]  }
 0x1ac   :  { %6567 = vmatpush3.bf16.msra.mxu1 %v7277_v22  ;;  %6546 = vmatprep.subr.bf16.mxu0 %v7278_v23  ;;  %v7317_v12 = vld [vmem:[#allocation5 + $0xab8] sm:$0xff]   ;;  %v7325_v22 = vld [vmem:[#allocation5 + $0xb80] sm:$0xff]   ;;  %v7326_v23 = vld [vmem:[#allocation5 + $0xb48] sm:$0xff]  }
 0x1ad   :  { %6568 = vmatprep.subr.bf16.mxu1 %v7279_v24  ;;  %v7327_v24 = vld [vmem:[#allocation5 + $0xbc8] sm:$0xff]  }
 0x1af   :  { %6547 = vmatpush3.bf16.msra.mxu0 %v7280_v25  ;;  %v7328_v25 = vld [vmem:[#allocation5 + $0xb08] sm:$0xff]  }
 0x1b0   :  { %6569 = vmatpush3.bf16.msra.mxu1 %v7281_v26  ;;  %6576 = vmatprep.subr.bf16.mxu0 %v7286_v32  ;;  %v7329_v26 = vld [vmem:[#allocation5 + $0xb88] sm:$0xff]   ;;  %v7335_v32 = vld [vmem:[#allocation5 + $0xbd8] sm:$0xff]  }
 0x1b1   :  { %6598 = vmatprep.subr.bf16.mxu1 %v7287_v34  ;;  %v7337_v34 = vld [vmem:[#allocation5 + $0xb98] sm:$0xff]  }
 0x1b2   :  { %4942 = vmatmul.mubr.bf16.vlgmr.msra.gmra.mrb[36].mxu0 %v5629_v29  ;;  %v7332_v29 = vld [vmem:[#allocation5 + $0xb10] sm:$0xff]  }
 0x1b3   :  { %4982 = vmatmul.mubr.bf16.vlgmr.msra.gmra.mrb[36].mxu1 %v5631_v31  ;;  %6577 = vmatpush3.bf16.msra.mxu0 %v7288_v35  ;;  %v7334_v31 = vld [vmem:[#allocation5 + $0xb58] sm:$0xff]   ;;  %v7338_v35 = vld [vmem:[#allocation5 + $0xb60] sm:$0xff]  }
 0x1b4   :  { %6599 = vmatpush3.bf16.msra.mxu1 %v7289_v36  ;;  %6578 = vmatprep.subr.bf16.mxu0 %v7290_v37  ;;  %v7339_v36 = vld [vmem:[#allocation5 + $0xbe0] sm:$0xff]  }
 0x1b5   :  { %6600 = vmatprep.subr.bf16.mxu1 %v7291_v38  ;;  %5021 = vmatprep.mubr.bf16.mxu0 %v5634_v15  ;;  %v7340_v38 = vld [vmem:[#allocation5 + $0xb20] sm:$0xff]   ;;  %v7368_v15 = vld [vmem:[#allocation5 + $0xc10] sm:$0xff]  }
 0x1b6   :  { %5061 = vmatprep.mubr.bf16.mxu1 %v5636_v18  ;;  %v7371_v18 = vld [vmem:[#allocation5 + $0xcd8] sm:$0xff]  }
 0x1b7   :  { %6579 = vmatpush3.bf16.msra.mxu0 %v7292_v39 }
 0x1b8   :  { %6601 = vmatpush3.bf16.msra.mxu1 %v7293_v40  ;;  %6580 = vmatprep.subr.bf16.mxu0 %v7294_v41  ;;  %v7341_v40 = vld [vmem:[#allocation5 + $0xba0] sm:$0xff]  }
 0x1b9   :  { %6602 = vmatprep.subr.bf16.mxu1 %v7295_v42 }
 0x1bb   :  { %6581 = vmatpush3.bf16.msra.mxu0 %v7296_v43  ;;  %v7342_v43 = vld [vmem:[#allocation5 + $0xb68] sm:$0xff]  }
 0x1bc   :  { %6603 = vmatpush3.bf16.msra.mxu1 %v7297_v44  ;;  %6582 = vmatprep.subr.bf16.mxu0 %v7298_v45 }
 0x1bd   :  { %6604 = vmatprep.subr.bf16.mxu1 %v7299_v46  ;;  %v7343_v46 = vld [vmem:[#allocation5 + $0xbe8] sm:$0xff]  }
 0x1bf   :  { %6583 = vmatpush3.bf16.msra.mxu0 %v7300_v47 }
 0x1c0   :  { %6605 = vmatpush3.bf16.msra.mxu1 %v7301_v48  ;;  %6584 = vmatprep.subr.bf16.mxu0 %v7302_v49  ;;  %v7344_v49 = vld [vmem:[#allocation5 + $0xb28] sm:$0xff]  }
 0x1c1   :  { %6606 = vmatprep.subr.bf16.mxu1 %v7303_v50 }
 0x1c3   :  { %6585 = vmatpush3.bf16.msra.mxu0 %v7304_v52 }
 0x1c4   :  { %6607 = vmatpush3.bf16.msra.mxu1 %v7305_v54  ;;  %6586 = vmatprep.subr.bf16.mxu0 %v7306_v57  ;;  %v7346_v54 = vld [vmem:[#allocation5 + $0xb70] sm:$0xff]  }
 0x1c5   :  { %v6284_v51 = vpop.f32.mrb[12].mxu0  ;;  %6608 = vmatprep.subr.bf16.mxu1 %v7307_v60  ;;  %v7348_v57 = vld [vmem:[#allocation5 + $0xb30] sm:$0xff]   ;;  %v7351_v60 = vld [vmem:[#allocation5 + $0xbf8] sm:$0xff]  }
 0x1c6   :  { %v6306_v53 = vpop.f32.mrb[12].mxu1  ;;  %v6285_v55 = vpop.f32.mrb[13].mxu0 }
 0x1c7   :  { %v6307_v56 = vpop.f32.mrb[13].mxu1  ;;  %v6286_v58 = vadd.f32 %v6285_v55, %v6284_v51  ;;  %v6287_v61 = vpop.f32.mrb[14].mxu0  ;;  %6587 = vmatpush3.bf16.msra.mxu0 %v7308_v63  ;;  %v7345_v51 = vld [vmem:[#allocation5 + $0xba8] sm:$0xff]   ;;  %v124_v63 = vld [vmem:[#allocation2 + $0xb0] sm:$0xff] }
 0x1c8   :  { %v6308_v59 = vadd.f32 %v6307_v56, %v6306_v53  ;;  %v6309_v62 = vpop.f32.mrb[14].mxu1  ;;  %v6288_v2 = vpop.f32.mrb[15].mxu0  ;;  %6609 = vmatpush3.bf16.msra.mxu1 %v7309_v1  ;;  %6588 = vmatprep.subr.bf16.mxu0 %v7310_v4  ;;  %v7347_v56 = vld [vmem:[#allocation5 + $0xbf0] sm:$0xff]   ;;  %v7352_v61 = vld [vmem:[#allocation5 + $0xb38] sm:$0xff]   ;;  %v5637_v1 = vcombine.low %v124_v63, %v124_v63 }
 0x1c9   :  { %v4464_v0 = vadd.f32 %v6286_v58, %v7762_v17  ;;  %v6310_v3 = vpop.f32.mrb[15].mxu1  ;;  %6610 = vmatprep.subr.bf16.mxu1 %v7311_v6  ;;  %v5635_v17 = vcombine.low %v123_v16, %v123_v16  ;;  %v7349_v58 = vld [vmem:[#allocation5 + $0xbb0] sm:$0xff]   ;;  %v7353_v62 = vld [vmem:[#allocation5 + $0xbb8] sm:$0xff]   ;;  %v5638_v2 = vcombine.high %v124_v63, %v124_v63  ;;  %v7359_v6 = vld [vmem:[#allocation5 + $0xcc0] sm:$0xff]  }
 0x1ca   :  { %v7369_v16 = vld [vmem:[#allocation5 + $0xc90] sm:$0xff]  }
 0x1cb   :  { %v7765_v5 = vadd.f32 %v6308_v59, %v4464_v0  ;;  %6589 = vmatpush3.bf16.msra.mxu0 %v7312_v7  ;;  %v7350_v59 = vld [vmem:[#allocation5 + $0xb78] sm:$0xff]   ;;  %v125_v0 = vld [vmem:[#allocation2 + $0xb8] sm:$0xff]  ;;  %v7360_v7 = vld [vmem:[#allocation5 + $0xc00] sm:$0xff]  }
 0x1cc   :  { %6611 = vmatpush3.bf16.msra.mxu1 %v7313_v8  ;;  %6590 = vmatprep.subr.bf16.mxu0 %v7314_v9  ;;  %v5639_v3 = vcombine.low %v125_v0, %v125_v0  ;;  %v5640_v4 = vcombine.high %v125_v0, %v125_v0  ;;  %v7361_v8 = vld [vmem:[#allocation5 + $0xc80] sm:$0xff]   ;;  %v7362_v9 = vld [vmem:[#allocation5 + $0xc48] sm:$0xff]   ;;  %v7402_v63 = vld [vmem:[#allocation5 + $0xd50] sm:$0xff]  }
 0x1cd   :  { %6612 = vmatprep.subr.bf16.mxu1 %v7315_v10  ;;  %v7363_v10 = vld [vmem:[#allocation5 + $0xcc8] sm:$0xff]   ;;  %v7403_v0 = vld [vmem:[#allocation5 + $0xdd0] sm:$0xff]  }
 0x1cf   :  { %6591 = vmatpush3.bf16.msra.mxu0 %v7316_v11  ;;  %v7364_v11 = vld [vmem:[#allocation5 + $0xc08] sm:$0xff]  }
 0x1d0   :  { %6613 = vmatpush3.bf16.msra.mxu1 %v7317_v12  ;;  %6620 = vmatprep.subr.bf16.mxu0 %v7322_v19  ;;  %v7365_v12 = vld [vmem:[#allocation5 + $0xc88] sm:$0xff]   ;;  %v7372_v19 = vld [vmem:[#allocation5 + $0xc18] sm:$0xff]  }
 0x1d1   :  { %6642 = vmatprep.subr.bf16.mxu1 %v7323_v20  ;;  %v7373_v20 = vld [vmem:[#allocation5 + $0xc98] sm:$0xff]  }
 0x1d2   :  { %5022 = vmatmul.mubr.bf16.vlgmr.msra.gmra.mrb[40].mxu0 %v5633_v14  ;;  %v7367_v14 = vld [vmem:[#allocation5 + $0xcd0] sm:$0xff]  }
 0x1d3   :  { %5062 = vmatmul.mubr.bf16.vlgmr.msra.gmra.mrb[40].mxu1 %v5635_v17  ;;  %6621 = vmatpush3.bf16.msra.mxu0 %v7324_v21  ;;  %v7370_v17 = vld [vmem:[#allocation5 + $0xc58] sm:$0xff]   ;;  %v7374_v21 = vld [vmem:[#allocation5 + $0xc60] sm:$0xff]  }
 0x1d4   :  { %6643 = vmatpush3.bf16.msra.mxu1 %v7325_v22  ;;  %6622 = vmatprep.subr.bf16.mxu0 %v7326_v23  ;;  %v7375_v22 = vld [vmem:[#allocation5 + $0xce0] sm:$0xff]  }
 0x1d5   :  { %6644 = vmatprep.subr.bf16.mxu1 %v7327_v24  ;;  %5101 = vmatprep.mubr.bf16.mxu0 %v5638_v2  ;;  %v7376_v24 = vld [vmem:[#allocation5 + $0xc20] sm:$0xff]   ;;  %v7405_v2 = vld [vmem:[#allocation5 + $0xd90] sm:$0xff]  }
 0x1d6   :  { %5141 = vmatprep.mubr.bf16.mxu1 %v5640_v4  ;;  %v7407_v4 = vld [vmem:[#allocation5 + $0xdd8] sm:$0xff]  }
 0x1d7   :  { %6623 = vmatpush3.bf16.msra.mxu0 %v7328_v25 }
 0x1d8   :  { %6645 = vmatpush3.bf16.msra.mxu1 %v7329_v26  ;;  %6624 = vmatprep.subr.bf16.mxu0 %v7330_v27  ;;  %v7377_v26 = vld [vmem:[#allocation5 + $0xca0] sm:$0xff]  }
 0x1d9   :  { %6646 = vmatprep.subr.bf16.mxu1 %v7331_v28 }
 0x1db   :  { %6625 = vmatpush3.bf16.msra.mxu0 %v7332_v29 }
 0x1dc   :  { %6647 = vmatpush3.bf16.msra.mxu1 %v7333_v30  ;;  %6626 = vmatprep.subr.bf16.mxu0 %v7334_v31  ;;  %v7378_v30 = vld [vmem:[#allocation5 + $0xc68] sm:$0xff]  }
 0x1dd   :  { %6648 = vmatprep.subr.bf16.mxu1 %v7335_v32  ;;  %v7379_v32 = vld [vmem:[#allocation5 + $0xce8] sm:$0xff]  }
 0x1df   :  { %6627 = vmatpush3.bf16.msra.mxu0 %v7336_v33 }
 0x1e0   :  { %6649 = vmatpush3.bf16.msra.mxu1 %v7337_v34  ;;  %6628 = vmatprep.subr.bf16.mxu0 %v7338_v35 }
 0x1e1   :  { %6650 = vmatprep.subr.bf16.mxu1 %v7339_v36  ;;  %v7380_v36 = vld [vmem:[#allocation5 + $0xc28] sm:$0xff]  }
 0x1e3   :  { %6629 = vmatpush3.bf16.msra.mxu0 %v7340_v38 }
 0x1e4   :  { %6651 = vmatpush3.bf16.msra.mxu1 %v7341_v40  ;;  %6630 = vmatprep.subr.bf16.mxu0 %v7342_v43  ;;  %v7384_v43 = vld [vmem:[#allocation5 + $0xc30] sm:$0xff]  }
 0x1e5   :  { %v6328_v37 = vpop.f32.mrb[16].mxu0  ;;  %6652 = vmatprep.subr.bf16.mxu1 %v7343_v46  ;;  %v7387_v46 = vld [vmem:[#allocation5 + $0xcf8] sm:$0xff]  }
 0x1e6   :  { %v6350_v39 = vpop.f32.mrb[16].mxu1  ;;  %v6329_v41 = vpop.f32.mrb[17].mxu0 }
 0x1e7   :  { %v6351_v42 = vpop.f32.mrb[17].mxu1  ;;  %v6330_v44 = vadd.f32 %v6329_v41, %v6328_v37  ;;  %v6331_v47 = vpop.f32.mrb[18].mxu0  ;;  %6631 = vmatpush3.bf16.msra.mxu0 %v7344_v49  ;;  %v7381_v37 = vld [vmem:[#allocation5 + $0xca8] sm:$0xff]   ;;  %v7382_v41 = vld [vmem:[#allocation5 + $0xc70] sm:$0xff]  }
 0x1e8   :  { %v6352_v45 = vadd.f32 %v6351_v42, %v6350_v39  ;;  %v6353_v48 = vpop.f32.mrb[18].mxu1  ;;  %v6332_v52 = vpop.f32.mrb[19].mxu0  ;;  %6653 = vmatpush3.bf16.msra.mxu1 %v7345_v51  ;;  %6632 = vmatprep.subr.bf16.mxu0 %v7346_v54  ;;  %v7383_v42 = vld [vmem:[#allocation5 + $0xcf0] sm:$0xff]   ;;  %v7388_v47 = vld [vmem:[#allocation5 + $0xc38] sm:$0xff]   ;;  %v7394_v54 = vld [vmem:[#allocation5 + $0xd40] sm:$0xff]  }
 0x1e9   :  { %v4544_v50 = vadd.f32 %v6330_v44, %v7765_v5  ;;  %v6354_v53 = vpop.f32.mrb[19].mxu1  ;;  %6654 = vmatprep.subr.bf16.mxu1 %v7347_v56  ;;  %v7358_v5 = vld [vmem:[#allocation5 + $0xc40] sm:$0xff]   ;;  %v7385_v44 = vld [vmem:[#allocation5 + $0xcb0] sm:$0xff]   ;;  %v7389_v48 = vld [vmem:[#allocation5 + $0xcb8] sm:$0xff]  }
 0x1ea   :  { %v126_v49 = vld [vmem:[#allocation2 + $0xc0] sm:$0xff]  ;;  %v7395_v56 = vld [vmem:[#allocation5 + $0xdc0] sm:$0xff]  }
 0x1eb   :  { %v7768_v55 = vadd.f32 %v6352_v45, %v4544_v50  ;;  %6633 = vmatpush3.bf16.msra.mxu0 %v7348_v57  ;;  %v7386_v45 = vld [vmem:[#allocation5 + $0xc78] sm:$0xff]   ;;  %v5641_v51 = vcombine.low %v126_v49, %v126_v49  ;;  %v5642_v52 = vcombine.high %v126_v49, %v126_v49  ;;  %v7396_v57 = vld [vmem:[#allocation5 + $0xd00] sm:$0xff]   ;;  %v7438_v49 = vld [vmem:[#allocation5 + $0xe50] sm:$0xff]  }
 0x1ec   :  { %6655 = vmatpush3.bf16.msra.mxu1 %v7349_v58  ;;  %6634 = vmatprep.subr.bf16.mxu0 %v7350_v59  ;;  %v127_v50 = vld [vmem:[#allocation2 + $0xc8] sm:$0xff]  ;;  %v7397_v58 = vld [vmem:[#allocation5 + $0xd80] sm:$0xff]   ;;  %v7398_v59 = vld [vmem:[#allocation5 + $0xd48] sm:$0xff]  }
 0x1ed   :  { %6656 = vmatprep.subr.bf16.mxu1 %v7351_v60  ;;  %v5643_v53 = vcombine.low %v127_v50, %v127_v50  ;;  %v7399_v60 = vld [vmem:[#allocation5 + $0xdc8] sm:$0xff]  }
 0x1ef   :  { %6635 = vmatpush3.bf16.msra.mxu0 %v7352_v61  ;;  %v7400_v61 = vld [vmem:[#allocation5 + $0xd08] sm:$0xff]  }
 0x1f0   :  { %6657 = vmatpush3.bf16.msra.mxu1 %v7353_v62  ;;  %6664 = vmatprep.subr.bf16.mxu0 %v7358_v5  ;;  %v7401_v62 = vld [vmem:[#allocation5 + $0xd88] sm:$0xff]   ;;  %v7408_v5 = vld [vmem:[#allocation5 + $0xd18] sm:$0xff]  }
 0x1f1   :  { %6686 = vmatprep.subr.bf16.mxu1 %v7359_v6  ;;  %v7409_v6 = vld [vmem:[#allocation5 + $0xd98] sm:$0xff]  }
 0x1f2   :  { %5102 = vmatmul.mubr.bf16.vlgmr.msra.gmra.mrb[44].mxu0 %v5637_v1  ;;  %v7404_v1 = vld [vmem:[#allocation5 + $0xd10] sm:$0xff]  }
 0x1f3   :  { %5142 = vmatmul.mubr.bf16.vlgmr.msra.gmra.mrb[44].mxu1 %v5639_v3  ;;  %6665 = vmatpush3.bf16.msra.mxu0 %v7360_v7  ;;  %v7406_v3 = vld [vmem:[#allocation5 + $0xd58] sm:$0xff]   ;;  %v7410_v7 = vld [vmem:[#allocation5 + $0xd60] sm:$0xff]  }
 0x1f4   :  { %6687 = vmatpush3.bf16.msra.mxu1 %v7361_v8  ;;  %6666 = vmatprep.subr.bf16.mxu0 %v7362_v9  ;;  %v7411_v8 = vld [vmem:[#allocation5 + $0xde0] sm:$0xff]  }
 0x1f5   :  { %6688 = vmatprep.subr.bf16.mxu1 %v7363_v10  ;;  %5181 = vmatprep.mubr.bf16.mxu0 %v5642_v52  ;;  %v7412_v10 = vld [vmem:[#allocation5 + $0xd20] sm:$0xff]   ;;  %v7441_v52 = vld [vmem:[#allocation5 + $0xe90] sm:$0xff]  }
 0x1f7   :  { %6667 = vmatpush3.bf16.msra.mxu0 %v7364_v11 }
 0x1f8   :  { %6689 = vmatpush3.bf16.msra.mxu1 %v7365_v12  ;;  %6668 = vmatprep.subr.bf16.mxu0 %v7366_v13  ;;  %v7413_v12 = vld [vmem:[#allocation5 + $0xda0] sm:$0xff]  }
 0x1f9   :  { %6690 = vmatprep.subr.bf16.mxu1 %v7367_v14 }
 0x1fb   :  { %6669 = vmatpush3.bf16.msra.mxu0 %v7368_v15  ;;  %v7414_v15 = vld [vmem:[#allocation5 + $0xd68] sm:$0xff]  }
 0x1fc   :  { %6691 = vmatpush3.bf16.msra.mxu1 %v7369_v16  ;;  %6670 = vmatprep.subr.bf16.mxu0 %v7370_v17 }
 0x1fd   :  { %6692 = vmatprep.subr.bf16.mxu1 %v7371_v18  ;;  %v7415_v18 = vld [vmem:[#allocation5 + $0xde8] sm:$0xff]  }
 0x1ff   :  { %6671 = vmatpush3.bf16.msra.mxu0 %v7372_v19 }
 0x200   :  { %6693 = vmatpush3.bf16.msra.mxu1 %v7373_v20  ;;  %6672 = vmatprep.subr.bf16.mxu0 %v7374_v21  ;;  %v7416_v21 = vld [vmem:[#allocation5 + $0xd28] sm:$0xff]  }
 0x201   :  { %6694 = vmatprep.subr.bf16.mxu1 %v7375_v22 }
 0x203   :  { %6673 = vmatpush3.bf16.msra.mxu0 %v7376_v24 }
 0x204   :  { %6695 = vmatpush3.bf16.msra.mxu1 %v7377_v26  ;;  %6674 = vmatprep.subr.bf16.mxu0 %v7378_v30  ;;  %v7418_v26 = vld [vmem:[#allocation5 + $0xd70] sm:$0xff]  }
 0x205   :  { %v6372_v23 = vpop.f32.mrb[20].mxu0  ;;  %6696 = vmatprep.subr.bf16.mxu1 %v7379_v32  ;;  %v7421_v30 = vld [vmem:[#allocation5 + $0xdb0] sm:$0xff]   ;;  %v7423_v32 = vld [vmem:[#allocation5 + $0xdf8] sm:$0xff]  }
 0x206   :  { %v6394_v25 = vpop.f32.mrb[20].mxu1  ;;  %v6373_v27 = vpop.f32.mrb[21].mxu0 }
 0x207   :  { %v6374_v28 = vadd.f32 %v6373_v27, %v6372_v23  ;;  %v6395_v29 = vpop.f32.mrb[21].mxu1  ;;  %v6375_v33 = vpop.f32.mrb[22].mxu0  ;;  %6675 = vmatpush3.bf16.msra.mxu0 %v7380_v36  ;;  %v7417_v23 = vld [vmem:[#allocation5 + $0xda8] sm:$0xff]  }
 0x208   :  { %v6396_v31 = vadd.f32 %v6395_v29, %v6394_v25  ;;  %v6397_v35 = vpop.f32.mrb[22].mxu1  ;;  %v6376_v38 = vpop.f32.mrb[23].mxu0  ;;  %6697 = vmatpush3.bf16.msra.mxu1 %v7381_v37  ;;  %6676 = vmatprep.subr.bf16.mxu0 %v7382_v41  ;;  %v7420_v29 = vld [vmem:[#allocation5 + $0xd30] sm:$0xff]   ;;  %v7424_v33 = vld [vmem:[#allocation5 + $0xd38] sm:$0xff]   ;;  %v7430_v41 = vld [vmem:[#allocation5 + $0xe40] sm:$0xff]  }
 0x209   :  { %v4624_v34 = vadd.f32 %v6374_v28, %v7768_v55  ;;  %v6398_v40 = vpop.f32.mrb[23].mxu1  ;;  %6698 = vmatprep.subr.bf16.mxu1 %v7383_v42  ;;  %v5644_v55 = vcombine.high %v127_v50, %v127_v50  ;;  %v7419_v28 = vld [vmem:[#allocation5 + $0xdf0] sm:$0xff]   ;;  %v128_v35 = vld [vmem:[#allocation2 + $0xd0] sm:$0xff]  ;;  %v129_v38 = vld [vmem:[#allocation2 + $0xd8] sm:$0xff] }
 0x20a   :  { %v5645_v36 = vcombine.low %v128_v35, %v128_v35  ;;  %v5646_v37 = vcombine.high %v128_v35, %v128_v35  ;;  %v5648_v40 = vcombine.high %v129_v38, %v129_v38  ;;  %v7431_v42 = vld [vmem:[#allocation5 + $0xec0] sm:$0xff]   ;;  %v7439_v50 = vld [vmem:[#allocation5 + $0xed0] sm:$0xff]  }
 0x20b   :  { %v7771_v39 = vadd.f32 %v6396_v31, %v4624_v34  ;;  %6677 = vmatpush3.bf16.msra.mxu0 %v7384_v43  ;;  %5221 = vmatprep.mubr.bf16.mxu1 %v5644_v55  ;;  %v7422_v31 = vld [vmem:[#allocation5 + $0xd78] sm:$0xff]   ;;  %v7432_v43 = vld [vmem:[#allocation5 + $0xe00] sm:$0xff]  }
 0x20c   :  { %6699 = vmatpush3.bf16.msra.mxu1 %v7385_v44  ;;  %6678 = vmatprep.subr.bf16.mxu0 %v7386_v45  ;;  %v7425_v34 = vld [vmem:[#allocation5 + $0xdb8] sm:$0xff]   ;;  %v7433_v44 = vld [vmem:[#allocation5 + $0xe80] sm:$0xff]   ;;  %v7434_v45 = vld [vmem:[#allocation5 + $0xe48] sm:$0xff]  }
 0x20d   :  { %6700 = vmatprep.subr.bf16.mxu1 %v7387_v46  ;;  %v7435_v46 = vld [vmem:[#allocation5 + $0xec8] sm:$0xff]   ;;  %v7444_v55 = vld [vmem:[#allocation5 + $0xe18] sm:$0xff]  }
 0x20f   :  { %6679 = vmatpush3.bf16.msra.mxu0 %v7388_v47  ;;  %v7436_v47 = vld [vmem:[#allocation5 + $0xe08] sm:$0xff]  }
 0x210   :  { %6701 = vmatpush3.bf16.msra.mxu1 %v7389_v48  ;;  %6708 = vmatprep.subr.bf16.mxu0 %v7394_v54  ;;  %v7437_v48 = vld [vmem:[#allocation5 + $0xe88] sm:$0xff]   ;;  %v7443_v54 = vld [vmem:[#allocation5 + $0xed8] sm:$0xff]  }
 0x211   :  { %6730 = vmatprep.subr.bf16.mxu1 %v7395_v56  ;;  %v7445_v56 = vld [vmem:[#allocation5 + $0xe98] sm:$0xff]  }
 0x212   :  { %5182 = vmatmul.mubr.bf16.vlgmr.msra.gmra.mrb[48].mxu0 %v5641_v51  ;;  %v7440_v51 = vld [vmem:[#allocation5 + $0xe10] sm:$0xff]  }
 0x213   :  { %5222 = vmatmul.mubr.bf16.vlgmr.msra.gmra.mrb[48].mxu1 %v5643_v53  ;;  %6709 = vmatpush3.bf16.msra.mxu0 %v7396_v57  ;;  %v7442_v53 = vld [vmem:[#allocation5 + $0xe58] sm:$0xff]   ;;  %v7446_v57 = vld [vmem:[#allocation5 + $0xe60] sm:$0xff]  }
 0x214   :  { %6731 = vmatpush3.bf16.msra.mxu1 %v7397_v58  ;;  %6710 = vmatprep.subr.bf16.mxu0 %v7398_v59  ;;  %v7447_v58 = vld [vmem:[#allocation5 + $0xee0] sm:$0xff]  }
 0x215   :  { %6732 = vmatprep.subr.bf16.mxu1 %v7399_v60  ;;  %5261 = vmatprep.mubr.bf16.mxu0 %v5646_v37  ;;  %v7448_v60 = vld [vmem:[#allocation5 + $0xe20] sm:$0xff]  }
 0x216   :  { %5301 = vmatprep.mubr.bf16.mxu1 %v5648_v40 }
 0x217   :  { %6711 = vmatpush3.bf16.msra.mxu0 %v7400_v61 }
 0x218   :  { %6733 = vmatpush3.bf16.msra.mxu1 %v7401_v62  ;;  %6712 = vmatprep.subr.bf16.mxu0 %v7402_v63  ;;  %v7449_v62 = vld [vmem:[#allocation5 + $0xea0] sm:$0xff]  }
 0x219   :  { %6734 = vmatprep.subr.bf16.mxu1 %v7403_v0 }
 0x21b   :  { %6713 = vmatpush3.bf16.msra.mxu0 %v7404_v1  ;;  %v7450_v1 = vld [vmem:[#allocation5 + $0xe68] sm:$0xff]  }
 0x21c   :  { %6735 = vmatpush3.bf16.msra.mxu1 %v7405_v2  ;;  %6714 = vmatprep.subr.bf16.mxu0 %v7406_v3 }
 0x21d   :  { %6736 = vmatprep.subr.bf16.mxu1 %v7407_v4  ;;  %v7451_v4 = vld [vmem:[#allocation5 + $0xee8] sm:$0xff]  }
 0x21f   :  { %6715 = vmatpush3.bf16.msra.mxu0 %v7408_v5 }
 0x220   :  { %6737 = vmatpush3.bf16.msra.mxu1 %v7409_v6  ;;  %6716 = vmatprep.subr.bf16.mxu0 %v7410_v7  ;;  %v7452_v7 = vld [vmem:[#allocation5 + $0xe28] sm:$0xff]  }
 0x221   :  { %6738 = vmatprep.subr.bf16.mxu1 %v7411_v8 }
 0x223   :  { %6717 = vmatpush3.bf16.msra.mxu0 %v7412_v10 }
 0x224   :  { %6739 = vmatpush3.bf16.msra.mxu1 %v7413_v12  ;;  %6718 = vmatprep.subr.bf16.mxu0 %v7414_v15  ;;  %v7454_v12 = vld [vmem:[#allocation5 + $0xe70] sm:$0xff]  }
 0x225   :  { %v6416_v9 = vpop.f32.mrb[24].mxu0  ;;  %6740 = vmatprep.subr.bf16.mxu1 %v7415_v18  ;;  %v7456_v15 = vld [vmem:[#allocation5 + $0xe30] sm:$0xff]   ;;  %v7459_v18 = vld [vmem:[#allocation5 + $0xef8] sm:$0xff]  }
 0x226   :  { %v6438_v11 = vpop.f32.mrb[24].mxu1  ;;  %v6417_v13 = vpop.f32.mrb[25].mxu0 }
 0x227   :  { %v6439_v14 = vpop.f32.mrb[25].mxu1  ;;  %v6418_v16 = vadd.f32 %v6417_v13, %v6416_v9  ;;  %v6419_v19 = vpop.f32.mrb[26].mxu0  ;;  %6719 = vmatpush3.bf16.msra.mxu0 %v7416_v21  ;;  %v7453_v9 = vld [vmem:[#allocation5 + $0xea8] sm:$0xff]   ;;  %v130_v21 = vld [vmem:[#allocation2 + $0xe0] sm:$0xff] }
 0x228   :  { %v6440_v17 = vadd.f32 %v6439_v14, %v6438_v11  ;;  %v6441_v20 = vpop.f32.mrb[26].mxu1  ;;  %v6420_v24 = vpop.f32.mrb[27].mxu0  ;;  %6741 = vmatpush3.bf16.msra.mxu1 %v7417_v23  ;;  %6720 = vmatprep.subr.bf16.mxu0 %v7418_v26  ;;  %v7455_v14 = vld [vmem:[#allocation5 + $0xef0] sm:$0xff]   ;;  %v7460_v19 = vld [vmem:[#allocation5 + $0xe38] sm:$0xff]   ;;  %v5649_v23 = vcombine.low %v130_v21, %v130_v21 }
 0x229   :  { %v4704_v22 = vadd.f32 %v6418_v16, %v7771_v39  ;;  %v6442_v25 = vpop.f32.mrb[27].mxu1  ;;  %6742 = vmatprep.subr.bf16.mxu1 %v7419_v28  ;;  %v5647_v39 = vcombine.low %v129_v38, %v129_v38  ;;  %v7457_v16 = vld [vmem:[#allocation5 + $0xeb0] sm:$0xff]   ;;  %v7461_v20 = vld [vmem:[#allocation5 + $0xeb8] sm:$0xff]   ;;  %v5650_v24 = vcombine.high %v130_v21, %v130_v21  ;;  %v5404_v21 = vld [vmem:[%s7852_s3 + $0x70] sm:$0xff] }
 0x22b   :  { %v7774_v27 = vadd.f32 %v6440_v17, %v4704_v22  ;;  %6721 = vmatpush3.bf16.msra.mxu0 %v7420_v29  ;;  %v7458_v17 = vld [vmem:[#allocation5 + $0xe78] sm:$0xff]  }
 0x22c   :  { %6743 = vmatpush3.bf16.msra.mxu1 %v7421_v30  ;;  %6722 = vmatprep.subr.bf16.mxu0 %v7422_v31  ;;  %v131_v22 = vld [vmem:[#allocation2 + $0xe8] sm:$0xff] }
 0x22d   :  { %6744 = vmatprep.subr.bf16.mxu1 %v7423_v32  ;;  %v5651_v25 = vcombine.low %v131_v22, %v131_v22  ;;  %v5652_v26 = vcombine.high %v131_v22, %v131_v22  ;;  %v5405_v22 = vld [vmem:[%s7852_s3 + $0x78] sm:$0xff] }
 0x22f   :  { %6723 = vmatpush3.bf16.msra.mxu0 %v7424_v33 }
 0x230   :  { %6745 = vmatpush3.bf16.msra.mxu1 %v7425_v34  ;;  %6752 = vmatprep.subr.bf16.mxu0 %v7430_v41 }
 0x231   :  { %6774 = vmatprep.subr.bf16.mxu1 %v7431_v42 }
 0x232   :  { %5262 = vmatmul.mubr.bf16.vlgmr.msra.gmra.mrb[52].mxu0 %v5645_v36 }
 0x233   :  { %5302 = vmatmul.mubr.bf16.vlgmr.msra.gmra.mrb[52].mxu1 %v5647_v39  ;;  %6753 = vmatpush3.bf16.msra.mxu0 %v7432_v43 }
 0x234   :  { %6775 = vmatpush3.bf16.msra.mxu1 %v7433_v44  ;;  %6754 = vmatprep.subr.bf16.mxu0 %v7434_v45 }
 0x235   :  { %6776 = vmatprep.subr.bf16.mxu1 %v7435_v46  ;;  %5341 = vmatprep.mubr.bf16.mxu0 %v5650_v24  ;;  %v7642_v24 = vmov 0.0  }
 0x236   :  { %5381 = vmatprep.mubr.bf16.mxu1 %v5652_v26  ;;  %v5485_v26 = vld [vmem:[#allocation10 + $0x8] sm:$0xff] }
 0x237   :  { %6755 = vmatpush3.bf16.msra.mxu0 %v7436_v47 }
 0x238   :  { %6777 = vmatpush3.bf16.msra.mxu1 %v7437_v48  ;;  %6756 = vmatprep.subr.bf16.mxu0 %v7438_v49 }
 0x239   :  { %6778 = vmatprep.subr.bf16.mxu1 %v7439_v50 }
 0x23b   :  { %6757 = vmatpush3.bf16.msra.mxu0 %v7440_v51  ;;  %v5390_v51 = vld [vmem:[%s7852_s3] sm:$0xff] }
 0x23c   :  { %6779 = vmatpush3.bf16.msra.mxu1 %v7441_v52  ;;  %6758 = vmatprep.subr.bf16.mxu0 %v7442_v53  ;;  %v5391_v52 = vld [vmem:[%s7852_s3 + $0x8] sm:$0xff]  ;;  %v5392_v53 = vld [vmem:[%s7852_s3 + $0x10] sm:$0xff] }
 0x23d   :  { %6780 = vmatprep.subr.bf16.mxu1 %v7443_v54  ;;  %v7640_v54 = vmov 0.0|0.0  }
 0x23f   :  { %6759 = vmatpush3.bf16.msra.mxu0 %v7444_v55  ;;  %v6877_v55 = vpack.c.bf16 %v5391_v52, %v5390_v51 }
 0x240   :  { %6781 = vmatpush3.bf16.msra.mxu1 %v7445_v56  ;;  %6760 = vmatprep.subr.bf16.mxu0 %v7446_v57  ;;  %v5393_v56 = vld [vmem:[%s7852_s3 + $0x18] sm:$0xff] }
 0x241   :  { %6782 = vmatprep.subr.bf16.mxu1 %v7447_v58  ;;  %v6880_v57 = vpack.c.bf16 %v5393_v56, %v5392_v53  ;;  %v5394_v58 = vld [vmem:[%s7852_s3 + $0x20] sm:$0xff] }
 0x243   :  { %6761 = vmatpush3.bf16.msra.mxu0 %v7448_v60 }
 0x244   :  { %6783 = vmatpush3.bf16.msra.mxu1 %v7449_v62  ;;  %6762 = vmatprep.subr.bf16.mxu0 %v7450_v1  ;;  %v5397_v62 = vld [vmem:[%s7852_s3 + $0x38] sm:$0xff]  ;;  %v5399_v1 = vld [vmem:[%s7852_s3 + $0x48] sm:$0xff] }
 0x245   :  { %v6460_v59 = vpop.f32.mrb[28].mxu0  ;;  %6784 = vmatprep.subr.bf16.mxu1 %v7451_v4  ;;  %v5401_v4 = vld [vmem:[%s7852_s3 + $0x58] sm:$0xff] }
 0x246   :  { %v6482_v61 = vpop.f32.mrb[28].mxu1  ;;  %v6461_v63 = vpop.f32.mrb[29].mxu0 }
 0x247   :  { %v6483_v0 = vpop.f32.mrb[29].mxu1  ;;  %v6462_v2 = vadd.f32 %v6461_v63, %v6460_v59  ;;  %v6463_v5 = vpop.f32.mrb[30].mxu0  ;;  %6763 = vmatpush3.bf16.msra.mxu0 %v7452_v7  ;;  %v5395_v59 = vld [vmem:[%s7852_s3 + $0x28] sm:$0xff] }
 0x248   :  { %v6484_v3 = vadd.f32 %v6483_v0, %v6482_v61  ;;  %v6485_v6 = vpop.f32.mrb[30].mxu1  ;;  %v6464_v10 = vpop.f32.mrb[31].mxu0  ;;  %6785 = vmatpush3.bf16.msra.mxu1 %v7453_v9  ;;  %6764 = vmatprep.subr.bf16.mxu0 %v7454_v12  ;;  %v6883_v60 = vpack.c.bf16 %v5395_v59, %v5394_v58  ;;  %v5396_v61 = vld [vmem:[%s7852_s3 + $0x30] sm:$0xff]  ;;  %v5398_v0 = vld [vmem:[%s7852_s3 + $0x40] sm:$0xff] }
 0x249   :  { %v4784_v8 = vadd.f32 %v6462_v2, %v7774_v27  ;;  %v6486_v11 = vpop.f32.mrb[31].mxu1  ;;  %6786 = vmatprep.subr.bf16.mxu1 %v7455_v14  ;;  %v6886_v63 = vpack.c.bf16 %v5397_v62, %v5396_v61  ;;  %v6889_v2 = vpack.c.bf16 %v5399_v1, %v5398_v0 }
 0x24b   :  { %v4824_v13 = vadd.f32 %v6484_v3, %v4784_v8  ;;  %6765 = vmatpush3.bf16.msra.mxu0 %v7456_v15  ;;  %v5400_v3 = vld [vmem:[%s7852_s3 + $0x50] sm:$0xff] }
 0x24c   :  { %6787 = vmatpush3.bf16.msra.mxu1 %v7457_v16  ;;  %6766 = vmatprep.subr.bf16.mxu0 %v7458_v17  ;;  %v6892_v5 = vpack.c.bf16 %v5401_v4, %v5400_v3  ;;  %v5402_v16 = vld [vmem:[%s7852_s3 + $0x60] sm:$0xff]  ;;  %v5403_v17 = vld [vmem:[%s7852_s3 + $0x68] sm:$0xff]  ;;  %s7643_s3 = smov [#allocation13]  }
 0x24d   :  { %6788 = vmatprep.subr.bf16.mxu1 %v7459_v18  ;;  %s5580_s27 = sshll.u32 %s7643_s3, 4  ;;  %s5581_s27 = int_to_ptr.vmem [resolvable:$true] %s5580_s27 }
 0x24e   :  { %s7598_s28 = scalar_lea.vmem %s5581_s27, 128  ;;  %p7603_p7 = scmp.lt.s32.totalorder %s5581_s27, %s5581_s27 }
 0x24f   :  { %6767 = vmatpush3.bf16.msra.mxu0 %v7460_v19  ;;  %v6895_v19 = vpack.c.bf16 %v5403_v17, %v5402_v16  ;;  %p7599_p6 = scmp.ne.s32.totalorder %s5581_s27, %s7598_s28  ;;  %p7604_p8 = scmp.lt.s32.totalorder %s7598_s28, %s7598_s28 }
 0x250   :  { %6789 = vmatpush3.bf16.msra.mxu1 %v7461_v20  ;;  %6876 = vmatprep.subr.bf16.mxu0 %v7640_v54 }
 0x251   :  { %6900 = vmatprep.subr.bf16.mxu1 %v7640_v54  ;;  %p7605_p9 = por %p7604_p8, %p7603_p7 }
 0x252   :  { %5342 = vmatmul.mubr.bf16.vlgmr.msra.gmra.mrb[56].mxu0 %v5649_v23  ;;  %v6898_v23 = vpack.c.bf16 %v5405_v22, %v5404_v21  ;;  %v6133_v22 = vld [vmem:[#allocation8] ss:$0 sm:$0xff] }
 0x253   :  { %5382 = vmatmul.mubr.bf16.vlgmr.msra.gmra.mrb[56].mxu1 %v5651_v25  ;;  %6878 = vmatpush3.bf16.msra.mxu0 %v6877_v55  ;;  %v5484_v25 = vld [vmem:[#allocation10] sm:$0xff]  ;;  %p7606_p10 = pnand %p7605_p9, %p7599_p6 }
 0x254   :  { %6879 = vmatprep.subr.bf16.mxu0 %v7640_v54  ;;  %6854 = vmatprep.mubr.msk.f32.mxu0 %vm7641_vm0, %v7642_v24 }
 0x255   :  { %6873 = vmatprep.mubr.msk.f32.mxu1 %vm7641_vm0, %v7642_v24 }
 0x257   :  { %6881 = vmatpush3.bf16.msra.mxu0 %v6880_v57 }
 0x258   :  { %6882 = vmatprep.subr.bf16.mxu0 %v7640_v54 }
 0x25b   :  { %6884 = vmatpush3.bf16.msra.mxu0 %v6883_v60 }
 0x25c   :  { %6885 = vmatprep.subr.bf16.mxu0 %v7640_v54 }
 0x25f   :  { %6887 = vmatpush3.bf16.msra.mxu0 %v6886_v63 }
 0x260   :  { %6888 = vmatprep.subr.bf16.mxu0 %v7640_v54 }
 0x263   :  { %6890 = vmatpush3.bf16.msra.mxu0 %v6889_v2 }
 0x264   :  { %6891 = vmatprep.subr.bf16.mxu0 %v7640_v54 }
 0x265   :  { %v6504_v27 = vpop.f32.mrb[32].mxu0 }
 0x266   :  { %v6526_v28 = vpop.f32.mrb[32].mxu1  ;;  %v6505_v29 = vpop.f32.mrb[33].mxu0 }
 0x267   :  { %v6506_v30 = vadd.f32 %v6505_v29, %v6504_v27  ;;  %v6527_v31 = vpop.f32.mrb[33].mxu1  ;;  %v6507_v32 = vpop.f32.mrb[34].mxu0  ;;  %6893 = vmatpush3.bf16.msra.mxu0 %v6892_v5  ;;  %v5486_v27 = vld [vmem:[#allocation10 + $0x10] sm:$0xff]  ;;  %v5487_v29 = vld [vmem:[#allocation10 + $0x18] sm:$0xff] }
 0x268   :  { %v6528_v33 = vadd.f32 %v6527_v31, %v6526_v28  ;;  %v6529_v34 = vpop.f32.mrb[34].mxu1  ;;  %v6508_v35 = vpop.f32.mrb[35].mxu0  ;;  %6894 = vmatprep.subr.bf16.mxu0 %v7640_v54  ;;  %v6901_v28 = vpack.c.bf16 %v5485_v26, %v5484_v25  ;;  %v5488_v31 = vld [vmem:[#allocation10 + $0x20] sm:$0xff]  ;;  %v5489_v32 = vld [vmem:[#allocation10 + $0x28] sm:$0xff] }
 0x269   :  { %v4864_v36 = vadd.f32 %v6506_v30, %v4824_v13  ;;  %v6530_v37 = vpop.f32.mrb[35].mxu1  ;;  %v6904_v30 = vpack.c.bf16 %v5487_v29, %v5486_v27  ;;  %v6134_v27 = vld [vmem:[#allocation11] ss:$0 sm:$0xff] }
 0x26a   :  { %6902 = vmatpush3.bf16.msra.mxu1 %v6901_v28 }
 0x26b   :  { %v4904_v38 = vadd.f32 %v6528_v33, %v4864_v36  ;;  %6896 = vmatpush3.bf16.msra.mxu0 %v6895_v19  ;;  %6903 = vmatprep.subr.bf16.mxu1 %v7640_v54  ;;  %v6907_v33 = vpack.c.bf16 %v5489_v32, %v5488_v31  ;;  %v5490_v19 = vld [vmem:[#allocation10 + $0x30] sm:$0xff] }
 0x26c   :  { %6897 = vmatprep.subr.bf16.mxu0 %v7640_v54 }
 0x26e   :  { %6905 = vmatpush3.bf16.msra.mxu1 %v6904_v30 }
 0x26f   :  { %6899 = vmatpush3.bf16.msra.mxu0 %v6898_v23  ;;  %6906 = vmatprep.subr.bf16.mxu1 %v7640_v54 }
 0x272   :  { %6908 = vmatpush3.bf16.msra.mxu1 %v6907_v33 }
 0x273   :  { %6909 = vmatprep.subr.bf16.mxu1 %v7640_v54 }
 0x285   :  { %v6548_v39 = vpop.f32.mrb[36].mxu0 }
 0x286   :  { %v6570_v40 = vpop.f32.mrb[36].mxu1  ;;  %v6549_v41 = vpop.f32.mrb[37].mxu0 }
 0x287   :  { %v6550_v42 = vadd.f32 %v6549_v41, %v6548_v39  ;;  %v6571_v43 = vpop.f32.mrb[37].mxu1  ;;  %v6551_v44 = vpop.f32.mrb[38].mxu0 }
 0x288   :  { %v6572_v45 = vadd.f32 %v6571_v43, %v6570_v40  ;;  %v6573_v46 = vpop.f32.mrb[38].mxu1  ;;  %v6552_v47 = vpop.f32.mrb[39].mxu0 }
 0x289   :  { %v4944_v48 = vadd.f32 %v6550_v42, %v4904_v38  ;;  %v6574_v49 = vpop.f32.mrb[39].mxu1 }
 0x28b   :  { %v4984_v50 = vadd.f32 %v6572_v45, %v4944_v48 }
 0x2a5   :  { %v6592_v6 = vpop.f32.mrb[40].mxu0 }
 0x2a6   :  { %v6614_v7 = vpop.f32.mrb[40].mxu1  ;;  %v6593_v8 = vpop.f32.mrb[41].mxu0 }
 0x2a7   :  { %v6615_v9 = vpop.f32.mrb[41].mxu1  ;;  %v6594_v10 = vadd.f32 %v6593_v8, %v6592_v6  ;;  %v6595_v12 = vpop.f32.mrb[42].mxu0 }
 0x2a8   :  { %v6616_v11 = vadd.f32 %v6615_v9, %v6614_v7  ;;  %v6617_v13 = vpop.f32.mrb[42].mxu1  ;;  %v6596_v14 = vpop.f32.mrb[43].mxu0 }
 0x2a9   :  { %v6618_v15 = vpop.f32.mrb[43].mxu1  ;;  %v5024_v18 = vadd.f32 %v6594_v10, %v4984_v50 }
 0x2ab   :  { %v5064_v20 = vadd.f32 %v6616_v11, %v5024_v18 }
 0x2c5   :  { %v6636_v34 = vpop.f32.mrb[44].mxu0 }
 0x2c6   :  { %v6658_v35 = vpop.f32.mrb[44].mxu1  ;;  %v6637_v36 = vpop.f32.mrb[45].mxu0 }
 0x2c7   :  { %v6638_v37 = vadd.f32 %v6637_v36, %v6636_v34  ;;  %v6659_v38 = vpop.f32.mrb[45].mxu1  ;;  %v6639_v39 = vpop.f32.mrb[46].mxu0 }
 0x2c8   :  { %v6660_v40 = vadd.f32 %v6659_v38, %v6658_v35  ;;  %v6661_v41 = vpop.f32.mrb[46].mxu1  ;;  %v6640_v42 = vpop.f32.mrb[47].mxu0 }
 0x2c9   :  { %v5104_v43 = vadd.f32 %v6638_v37, %v5064_v20  ;;  %v6662_v44 = vpop.f32.mrb[47].mxu1  ;;  %v5491_v20 = vld [vmem:[#allocation10 + $0x38] sm:$0xff] }
 0x2ca   :  { %v6910_v21 = vpack.c.bf16 %v5491_v20, %v5490_v19 }
 0x2cb   :  { %v5144_v45 = vadd.f32 %v6660_v40, %v5104_v43 }
 0x2cc   :  { %6911 = vmatpush3.bf16.msra.mxu1 %v6910_v21 }
 0x2e5   :  { %v6680_v46 = vpop.f32.mrb[48].mxu0 }
 0x2e6   :  { %v6702_v47 = vpop.f32.mrb[48].mxu1  ;;  %v6681_v48 = vpop.f32.mrb[49].mxu0 }
 0x2e7   :  { %v6682_v49 = vadd.f32 %v6681_v48, %v6680_v46  ;;  %v6703_v50 = vpop.f32.mrb[49].mxu1  ;;  %v6683_v51 = vpop.f32.mrb[50].mxu0 }
 0x2e8   :  { %v6704_v52 = vadd.f32 %v6703_v50, %v6702_v47  ;;  %v6705_v53 = vpop.f32.mrb[50].mxu1  ;;  %v6684_v54 = vpop.f32.mrb[51].mxu0 }
 0x2e9   :  { %v5184_v55 = vadd.f32 %v6682_v49, %v5144_v45  ;;  %v6706_v56 = vpop.f32.mrb[51].mxu1 }
 0x2eb   :  { %v5224_v57 = vadd.f32 %v6704_v52, %v5184_v55 }
 0x305   :  { %v6724_v58 = vpop.f32.mrb[52].mxu0 }
 0x306   :  { %v6746_v59 = vpop.f32.mrb[52].mxu1  ;;  %v6725_v60 = vpop.f32.mrb[53].mxu0 }
 0x307   :  { %v6747_v61 = vpop.f32.mrb[53].mxu1  ;;  %v6726_v62 = vadd.f32 %v6725_v60, %v6724_v58  ;;  %v6727_v0 = vpop.f32.mrb[54].mxu0 }
 0x308   :  { %v6748_v63 = vadd.f32 %v6747_v61, %v6746_v59  ;;  %v6749_v1 = vpop.f32.mrb[54].mxu1  ;;  %v6728_v2 = vpop.f32.mrb[55].mxu0 }
 0x309   :  { %v6750_v3 = vpop.f32.mrb[55].mxu1  ;;  %v5264_v4 = vadd.f32 %v6726_v62, %v5224_v57 }
 0x30b   :  { %v5304_v5 = vadd.f32 %v6748_v63, %v5264_v4 }
 0x325   :  { %v6768_v6 = vpop.f32.mrb[56].mxu0 }
 0x326   :  { %v6790_v7 = vpop.f32.mrb[56].mxu1  ;;  %v6769_v8 = vpop.f32.mrb[57].mxu0 }
 0x327   :  { %v6770_v9 = vadd.f32 %v6769_v8, %v6768_v6  ;;  %v6791_v10 = vpop.f32.mrb[57].mxu1  ;;  %v6771_v11 = vpop.f32.mrb[58].mxu0 }
 0x328   :  { %v6792_v12 = vadd.f32 %v6791_v10, %v6790_v7  ;;  %v6793_v13 = vpop.f32.mrb[58].mxu1  ;;  %v6772_v14 = vpop.f32.mrb[59].mxu0 }
 0x329   :  { %v5344_v15 = vadd.f32 %v6770_v9, %v5304_v5  ;;  %v6794_v16 = vpop.f32.mrb[59].mxu1 }
 0x32b   :  { %v5384_v17 = vadd.f32 %v6792_v12, %v5344_v15 }
 0x32d   :  { %v5389_v18 = vmax.f32 %v5384_v17, 0.0 }
 0x32f   :  { %6855 = vmatmul.mubr.f32.vlgmr.msra.gmra.mrb[60].mxu0 %v5389_v18 }
 0x402   :  { %v5479_v23 = vpop.f32.mrb[60].mxu0 }
 0x403   :  { %v5480_v24 = vadd.f32 %v6133_v22, %v5479_v23  ;;  %v6856_v25 = vpop.f32.mrb[61].mxu0 }
 0x405   :  { %v5483_v26 = vmax.f32 %v5480_v24, 0.0 }
 0x407   :  { %6874 = vmatmul.mubr.msk.f32.vlgmr.msra.gmra.mrb[60].mxu1 %vm5499_vm1, %v5483_v26 }
 0x4da   :  { %v5569_v28 = vpop.f32.mrb[60].mxu1 }
 0x4db   :  { %v5570_v29 = vadd.f32 %v6134_v27, %v5569_v28  ;;  %v6875_v30 = vpop.f32.mrb[61].mxu1 }
 0x4dd   :  { %5573 = vst [vmem:[#allocation13] sm:$0xff] %v5570_v29 }
 0x4de   :  { %7609 = shalt.err (!%p7606_p10)
}
 0x4df   :  { %s7610_s8 = scalar_lea.hbm %s7856_s7, 128 }
 0x4e0   :  { %p7611_p11 = scmp.ne.s32.totalorder %s7856_s7, %s7610_s8  ;;  %p7614_p12 = scmp.lt.u32.totalorder %s7610_s8, %s7856_s7 }
 0x4e2   :  { %p7616_p13 = pnand %p7614_p12, %p7611_p11 }
 0x4e4   :  { %7619 = shalt.err (!%p7616_p13)
}
 0x4e5   :  { %5583 = dma.vmem_to_hbm [thread:$0]  %s5581_s27, 128, %s7856_s7, [#allocation4]  }
 0x4e6   :  { %7628 = dma.done.wait [#allocation4], 128  }
 0x4e7   :  { %7629 = vsyncadd [#allocation4], 4294967168 }
 0x4e8   :  { %5587 = vsyncpa [#allocation3], 1 }
 0x4e9   :  { %5588 = vsyncpa [#allocation6], 1 }
 0x4ea   :  { %5589 = vsyncpa [#allocation9], 1 }
 0x4eb   :  { %5590 = vsyncpa [#allocation12], 1 }
 0x4ec   :  { %5591 = vsyncpa [#allocation4], 1 }

</bundles_post_ra>
